<compile_context>
chip_gen: v7x
topology: tpu7x:2x2x1
jax: 0.10.0
libtpu: 0.0.40
codegen_flags: <defaults>
</compile_context>

<pallas_src>
import functools

import jax
import jax.numpy as jnp
from jax import lax
from jax.experimental import pallas as pl
from jax.experimental.pallas import tpu as pltpu

_LANE = 128


def _inverted_residual_kernel(*refs, stride, expand_ratio, use_shortcut,
                              img_h, img_w, strip_rows, out_rows):
  if expand_ratio != 1:
    (x_hbm, w_exp_ref, b_exp_ref, w_dw_ref, b_dw_ref,
     w_proj_ref, b_proj_ref, o_ref, *scratch) = refs
  else:
    (x_hbm, w_dw_ref, b_dw_ref, w_proj_ref, b_proj_ref, o_ref, *scratch) = refs
  if stride == 2:
    xbuf, xsem, hbuf = scratch
  else:
    xbuf, xsem = scratch

  W = img_w
  rows_in = strip_rows + 2                         # strip + 1-row halo each side
  wo = (W - 1) // stride + 1
  chid_p = w_dw_ref.shape[-1]

  b = pl.program_id(0)
  s = pl.program_id(1)
  n_strips = pl.num_programs(1)

  # ---- manual double-buffered halo-strip DMA (P4) -------------------------
  # x is stored flattened as ((B*(H+2))*W, Cin_p); strip s of image b needs
  # padded rows [s*strip_rows, s*strip_rows + rows_in), always in bounds.
  def x_copy(strip_idx, slot_idx):
    off = (b * (img_h + 2) + strip_idx * strip_rows) * W
    return pltpu.make_async_copy(
        x_hbm.at[pl.ds(off, rows_in * W)],
        xbuf.at[slot_idx], xsem.at[slot_idx])

  slot = lax.rem(s, 2)

  @pl.when(s == 0)                 # prime once per image (strip axis is
  def _():                         # "arbitrary", so s runs in order per image)
    x_copy(0, 0).start()

  x_copy(s, slot).wait()

  @pl.when(s + 1 < n_strips)       # prefetch the next strip of the same image
  def _():
    x_copy(s + 1, 1 - slot).start()

  xs = xbuf[slot]                                  # (rows_in*W, Cin_p) f32

  # ---- 1x1 expand conv (BN scale folded into the weight) + bias + ReLU6 ---
  if expand_ratio != 1:
    mm = jnp.dot(xs.astype(jnp.bfloat16), w_exp_ref[...],
                 preferred_element_type=jnp.float32)     # (rows_in*W, Chid_p)
    h = mm.reshape(rows_in, W, chid_p)
    # Halo rows outside the image must be ZERO in the *expanded* domain (the
    # depthwise conv zero-pads h, not x).  x is already zero on those rows
    # (wrapper padding), so only the bias needs masking; folding the row
    # validity into the (tiny) bias operand costs no extra full-block VALU op.
    row = lax.broadcasted_iota(jnp.int32, (rows_in, 1, 1), 0)
    g_row = s * strip_rows - 1 + row
    valid = jnp.logical_and(g_row >= 0, g_row < img_h).astype(jnp.float32)
    h = jnp.clip(h + b_exp_ref[...].reshape(1, 1, chid_p) * valid, 0.0, 6.0)
  else:
    # MobileNetV2 invariant on this path: Chid == Cin (asserted in wrapper);
    # halo rows of x are already zero.
    h = xs.reshape(rows_in, W, chid_p)

  # ---- depthwise 3x3 conv (padding=1, stride=s) + bias + ReLU6 ------------
  wd = w_dw_ref[...]                               # (3, 3, Chid_p) f32
  zcol = jnp.zeros((rows_in, 1, chid_p), jnp.float32)

  # Build the three kx-shifted column slabs ONCE (hoisted out of the ky loop).
  # The W-direction zero padding is done in-register, so no (W+2)-wide scratch
  # and no width-1 masked border stores are needed.
  # TODO(synk): bf16 slabs + bf16 tap accumulation would roughly double the
  # VALU rate on v6e/v7x; kept f32 here for v5e compatibility / precision.
  if stride == 1:
    slabs = (jnp.concatenate([zcol, h[:, :W - 1, :]], axis=1),   # kx = 0
             h,                                                   # kx = 1
             jnp.concatenate([h[:, 1:, :], zcol], axis=1))        # kx = 2

    def tap(ky, kx):
      return slabs[kx][ky:ky + out_rows]           # leading-dim slice: free
  else:
    # stride == 2: park h once in a full-width, aligned scratch and read the
    # two W phases back with strided ref loads (2 strided accesses instead of
    # 9 per-tap strided slices).
    hbuf[...] = h
    n_odd = W // 2
    even = hbuf[:, pl.ds(0, wo, 2), :]             # image cols 0,2,...  (kx=1)
    odd = hbuf[:, pl.ds(1, n_odd, 2), :]           # image cols 1,3,...
    kx2 = odd if n_odd == wo else jnp.concatenate([odd, zcol], axis=1)
    kx0 = jnp.concatenate([zcol, odd[:, :wo - 1, :]], axis=1)
    slabs = (kx0, even, kx2)

    # H-direction even/odd row phases via a free leading-dim reshape (no
    # strided slicing along the row axis).
    def row_phases(slab):
      r = slab.shape[0]
      if r % 2:
        slab = jnp.concatenate(
            [slab, jnp.zeros((1,) + slab.shape[1:], slab.dtype)], axis=0)
        r += 1
      s4 = slab.reshape(r // 2, 2, wo, chid_p)
      return s4[:, 0], s4[:, 1]

    phases = tuple(row_phases(sl) for sl in slabs)

    def tap(ky, kx):
      ev, od = phases[kx]
      if ky == 0:
        return ev[0:out_rows]
      if ky == 1:
        return od[0:out_rows]
      return ev[1:out_rows + 1]

  acc = None                                       # init from first tap
  for ky in range(3):
    for kx in range(3):
      contrib = tap(ky, kx) * wd[ky, kx]
      acc = contrib if acc is None else acc + contrib

  d = jnp.clip(acc + b_dw_ref[...].reshape(1, 1, chid_p), 0.0, 6.0)

  # ---- 1x1 project conv (BN scale folded) + bias, linear ------------------
  out = jnp.dot(d.reshape(out_rows * wo, chid_p).astype(jnp.bfloat16),
                w_proj_ref[...], preferred_element_type=jnp.float32)
  out = out + b_proj_ref[...]

  # ---- residual shortcut ---------------------------------------------------
  if use_shortcut:                                 # stride==1 and Cin==Cout
    out = out + xs[W:(strip_rows + 1) * W, :]      # interior rows of the strip

  o_ref[0] = out.astype(o_ref.dtype)               # lane-dense, 8-aligned store


def _pad_to(a, axis, size):
  if a.shape[axis] == size:
    return a
  widths = [(0, 0)] * a.ndim
  widths[axis] = (0, size - a.shape[axis])
  return jnp.pad(a, widths)


def _replicated_spec(shape):
  # Weights/biases never change across the grid -> single-buffer them so they
  # do not burn a second VMEM copy (matters under v7x's 64 MiB per-core VMEM).
  n = len(shape)
  return pl.BlockSpec(shape, lambda b, s, _n=n: (0,) * _n,
                      pipeline_mode=pl.Buffered(1))


def _vmem_limit_bytes():
  # Generation-aware scoped-VMEM request: ~3/4 of per-core capacity
  # (v7x: 48 MiB of 64; v5e/v6e: 96 MiB of 128), leaving headroom for the
  # pipeline double buffers and compiler-internal scratch.
  try:
    cap = pltpu.get_tpu_info().vmem_capacity_bytes
    return max(32 * 1024 * 1024, min((cap * 3) // 4, 96 * 1024 * 1024))
  except Exception:
    return 48 * 1024 * 1024        # safe on every generation


def _pick_strip_rows(H, W, stride, chid_p, requested):
  """Largest input-row strip whose working set fits a VMEM budget.

  Constraints: the strip tiles H exactly, is a multiple of `stride`, and
  gives an output block with an 8-aligned sublane extent (unmasked stores).
  `strip_rows == H` (single strip) is always legal.
  """
  wo = (W - 1) // stride + 1

  def valid(r):
    if r == H:
      return True
    return (H % r == 0) and (r % stride == 0) and (((r // stride) * wo) % 8 == 0)

  if requested is not None:
    assert valid(requested), (
        f"unsupported strip_rows={requested} for H={H}, stride={stride}")
    return requested

  budget = 24 * 1024 * 1024        # rough per-strip activation budget
  cands = sorted((r for r in range(1, H + 1) if valid(r)), reverse=True)
  for r in cands:
    if (r + 2) * W * chid_p * 4 * 6 <= budget:     # x + h + slabs + acc (f32)
      return r
  return cands[-1]


def inverted_residual(x_nchw, params, *, stride, expand_ratio, strip_rows=None):
  """NCHW in, NCHW out — matches the PyTorch `InvertedResidual.forward` (eval BN)."""
  assert stride in (1, 2)
  B, Cin, H, W = x_nchw.shape
  Chid = params["w_dw"].shape[2]
  Cout = params["w_proj"].shape[1]
  if expand_ratio == 1:
    assert Chid == Cin, "expand_ratio==1 requires hidden==in channels"
  use_shortcut = (stride == 1 and Cin == Cout)
  Ho = (H - 1) // stride + 1
  Wo = (W - 1) // stride + 1

  Cin_p = pl.cdiv(Cin, _LANE) * _LANE
  Chid_p = pl.cdiv(Chid, _LANE) * _LANE
  Cout_p = pl.cdiv(Cout, _LANE) * _LANE
  if use_shortcut:
    assert Cin_p == Cout_p

  strip_rows = _pick_strip_rows(H, W, stride, Chid_p, strip_rows)
  n_strips = H // strip_rows if strip_rows < H else 1
  out_rows = Ho if n_strips == 1 else strip_rows // stride

  # Fold eval-mode BN scales into the conv weights, pad channels to lane
  # multiples, cast the 1x1-conv weights to bf16 once here.
  w_dw = _pad_to(params["w_dw"] * params["s_dw"].reshape(1, 1, Chid), 2, Chid_p)
  b_dw = _pad_to(params["b_dw"], 1, Chid_p)
  w_proj = _pad_to(_pad_to(params["w_proj"] * params["s_proj"], 0, Chid_p),
                   1, Cout_p).astype(jnp.bfloat16)
  b_proj = _pad_to(params["b_proj"], 1, Cout_p)

  # NHWC, channel-padded, 1 zero row of H padding each side (halo source for
  # the first/last strip), then flattened so strip DMAs are contiguous and the
  # expand-matmul LHS needs no in-kernel reshape.
  # TODO(synk): keep the whole network in padded NHWC (optionally bf16)
  # between blocks to drop this per-layer NCHW<->NHWC HBM round trip.
  x = jnp.transpose(x_nchw.astype(jnp.float32), (0, 2, 3, 1))
  x = jnp.pad(x, ((0, 0), (1, 1), (0, 0), (0, Cin_p - Cin)))
  x_flat = x.reshape(B * (H + 2) * W, Cin_p)

  operands = [x_flat]
  in_specs = [pl.BlockSpec(memory_space=pl.ANY)]   # halo strips DMA'd manually
  if expand_ratio != 1:
    w_exp = _pad_to(_pad_to(params["w_exp"] * params["s_exp"], 0, Cin_p),
                    1, Chid_p).astype(jnp.bfloat16)
    b_exp = _pad_to(params["b_exp"], 1, Chid_p)
    operands += [w_exp, b_exp]
    in_specs += [_replicated_spec(w_exp.shape), _replicated_spec(b_exp.shape)]
  operands += [w_dw, b_dw, w_proj, b_proj]
  in_specs += [_replicated_spec(w_dw.shape), _replicated_spec(b_dw.shape),
               _replicated_spec(w_proj.shape), _replicated_spec(b_proj.shape)]

  scratch_shapes = [
      pltpu.VMEM((2, (strip_rows + 2) * W, Cin_p), jnp.float32),  # x halo strips
      pltpu.SemaphoreType.DMA((2,)),
  ]
  if stride == 2:
    scratch_shapes.append(pltpu.VMEM((strip_rows + 2, W, Chid_p), jnp.float32))

  kernel = functools.partial(
      _inverted_residual_kernel,
      stride=stride, expand_ratio=expand_ratio, use_shortcut=use_shortcut,
      img_h=H, img_w=W, strip_rows=strip_rows, out_rows=out_rows)

  # TODO(synk): for late MobileNetV2 layers (7x7/14x14) fold several batch
  # images into one grid step so the 1x1-conv matmul M dim is >= 256 on
  # v6e/v7x.
  # TODO(synk): split the strip axis into (parallel outer, arbitrary inner)
  # sub-axes so both v7x TensorCores get work when B == 1 while keeping the
  # in-kernel strip prefetch legal.
  out_flat = pl.pallas_call(
      kernel,
      out_shape=jax.ShapeDtypeStruct((B, Ho * Wo, Cout_p), jnp.float32),
      grid=(B, n_strips),
      in_specs=in_specs,
      out_specs=pl.BlockSpec((1, out_rows * Wo, Cout_p), lambda b, s: (b, s, 0)),
      scratch_shapes=scratch_shapes,
      compiler_params=pltpu.CompilerParams(
          dimension_semantics=("parallel", "arbitrary"),
          vmem_limit_bytes=_vmem_limit_bytes()),
  )(*operands)

  out = out_flat.reshape(B, Ho, Wo, Cout_p)[:, :, :, :Cout]
  return jnp.transpose(out, (0, 3, 1, 2))          # back to NCHW


def _reference_forward(x_nchw, params, *, stride, expand_ratio):
  """Pure-JAX NCHW reference (mirrors the PyTorch forward, eval-mode BN)."""
  B, Cin, H, W = x_nchw.shape
  Chid = params["w_dw"].shape[2]
  Cout = params["w_proj"].shape[1]
  use_shortcut = (stride == 1 and Cin == Cout)
  x = x_nchw.astype(jnp.float32)
  h = x
  if expand_ratio != 1:
    w = jnp.transpose(params["w_exp"], (1, 0)).reshape(Chid, Cin, 1, 1)
    h = lax.conv_general_dilated(
        h, w, (1, 1), "VALID", dimension_numbers=("NCHW", "OIHW", "NCHW"))
    h = h * params["s_exp"].reshape(1, Chid, 1, 1) + params["b_exp"].reshape(1, Chid, 1, 1)
    h = jnp.clip(h, 0.0, 6.0)
  wd = jnp.transpose(params["w_dw"], (2, 0, 1)).reshape(Chid, 1, 3, 3)
  h = lax.conv_general_dilated(
      h, wd, (stride, stride), ((1, 1), (1, 1)),
      dimension_numbers=("NCHW", "OIHW", "NCHW"), feature_group_count=Chid)
  h = h * params["s_dw"].reshape(1, Chid, 1, 1) + params["b_dw"].reshape(1, Chid, 1, 1)
  h = jnp.clip(h, 0.0, 6.0)
  wp = jnp.transpose(params["w_proj"], (1, 0)).reshape(Cout, Chid, 1, 1)
  h = lax.conv_general_dilated(
      h, wp, (1, 1), "VALID", dimension_numbers=("NCHW", "OIHW", "NCHW"))
  h = h * params["s_proj"].reshape(1, Cout, 1, 1) + params["b_proj"].reshape(1, Cout, 1, 1)
  if use_shortcut:
    h = h + x
  return h


def _make_params(key, in_channel, out_channel, expand_ratio):
  """Deterministic synthetic parameters (BN as per-channel scale/bias)."""
  Chid = in_channel * expand_ratio
  ks = jax.random.split(key, 16)

  def bn_fold(kg, kb, km, kv, C):
    gamma = 1.0 + 0.1 * jax.random.normal(kg, (C,), jnp.float32)
    beta = 0.1 * jax.random.normal(kb, (C,), jnp.float32)
    mean = 0.1 * jax.random.normal(km, (C,), jnp.float32)
    var = jnp.abs(jax.random.normal(kv, (C,), jnp.float32)) + 0.5
    scale = gamma * lax.rsqrt(var + 1e-5)
    bias = beta - mean * scale
    return scale.reshape(1, C), bias.reshape(1, C)

  s_exp, b_exp = bn_fold(ks[0], ks[1], ks[2], ks[3], Chid)
  s_dw, b_dw = bn_fold(ks[4], ks[5], ks[6], ks[7], Chid)
  s_proj, b_proj = bn_fold(ks[8], ks[9], ks[10], ks[11], out_channel)

  return {
      "w_exp": 0.2 * jax.random.normal(ks[12], (in_channel, Chid), jnp.float32),
      "s_exp": s_exp, "b_exp": b_exp,
      "w_dw": 0.2 * jax.random.normal(ks[13], (3, 3, Chid), jnp.float32),
      "s_dw": s_dw, "b_dw": b_dw,
      "w_proj": 0.2 * jax.random.normal(ks[14], (Chid, out_channel), jnp.float32),
      "s_proj": s_proj, "b_proj": b_proj,
  }


if __name__ == "__main__":
  key = jax.random.PRNGKey(0)
  k_x1, k_p1, k_x2, k_p2, k_x3, k_p3 = jax.random.split(key, 6)

  def _check(name, x, params, stride, expand, strip_rows=None):
    y = jax.block_until_ready(
        inverted_residual(x, params, stride=stride, expand_ratio=expand,
                          strip_rows=strip_rows))
    y_ref = _reference_forward(x, params, stride=stride, expand_ratio=expand)
    assert y.shape == y_ref.shape, (name, y.shape, y_ref.shape)
    err = float(jnp.max(jnp.abs(y - y_ref)))
    assert bool(jnp.allclose(y, y_ref, atol=5e-2, rtol=5e-2)), (name, err)

  B, Cin, H, W = 2, 4, 16, 16

  # Case 1: expand=6, stride=1, Cin==Cout -> expand conv + residual shortcut,
  # two 8-row strips (exercises halo DMA + prefetch).
  x1 = jax.random.normal(k_x1, (B, Cin, H, W), jnp.float32)
  p1 = _make_params(k_p1, Cin, Cin, 6)
  _check("expand6_s1_shortcut", x1, p1, 1, 6, strip_rows=8)

  # Case 2: expand=1, stride=1, Cin!=Cout -> no expand conv, no shortcut,
  # auto strip selection (single strip).
  x2 = jax.random.normal(k_x2, (B, Cin, H, W), jnp.float32)
  p2 = _make_params(k_p2, Cin, 8, 1)
  _check("expand1_s1", x2, p2, 1, 1)

  # Case 3: expand=6, stride=2 -> strided depthwise (even/odd W phases),
  # two 8-row strips.
  x3 = jax.random.normal(k_x3, (B, Cin, H, W), jnp.float32)
  p3 = _make_params(k_p3, Cin, 8, 6)
  _check("expand6_s2", x3, p3, 2, 6, strip_rows=8)

  print("KERNEL_OK")
</pallas_src>

<mosaic_0001>
module attributes {stable_mosaic.version = 11 : i64} {
  func.func @_inverted_residual_kernel(%arg0: i32, %arg1: i32, %arg2: memref<576x128xf32, #tpu.memory_space<any>>, %arg3: memref<128x128xbf16, #tpu.memory_space<vmem>>, %arg4: memref<1x128xf32, #tpu.memory_space<vmem>>, %arg5: memref<3x3x128xf32, #tpu.memory_space<vmem>>, %arg6: memref<1x128xf32, #tpu.memory_space<vmem>>, %arg7: memref<128x128xbf16, #tpu.memory_space<vmem>>, %arg8: memref<1x128xf32, #tpu.memory_space<vmem>>, %arg9: memref<1x128x128xf32, #tpu.memory_space<vmem>>, %arg10: memref<2x160x128xf32, #tpu.memory_space<vmem>>, %arg11: memref<2x!tpu.dma_semaphore, #tpu.memory_space<semaphore_mem>>) attributes {dimension_semantics = [#tpu.dimension_semantics<parallel>, #tpu.dimension_semantics<arbitrary>], iteration_bounds = array<i64: 2, 2>, scalar_prefetch = 0 : i64, scratch_operands = 2 : i64, tpu.core_type = #tpu.core_type<tc>, window_params = [{}, {pipeline_mode = #tpu.pipeline_mode<synchronous>, transform_indices = @transform_1, window_bounds = array<i64: 128, 128>}, {pipeline_mode = #tpu.pipeline_mode<synchronous>, transform_indices = @transform_2, window_bounds = array<i64: 1, 128>}, {pipeline_mode = #tpu.pipeline_mode<synchronous>, transform_indices = @transform_3, window_bounds = array<i64: 3, 3, 128>}, {pipeline_mode = #tpu.pipeline_mode<synchronous>, transform_indices = @transform_4, window_bounds = array<i64: 1, 128>}, {pipeline_mode = #tpu.pipeline_mode<synchronous>, transform_indices = @transform_5, window_bounds = array<i64: 128, 128>}, {pipeline_mode = #tpu.pipeline_mode<synchronous>, transform_indices = @transform_6, window_bounds = array<i64: 1, 128>}, {transform_indices = @transform_7, window_bounds = array<i64: 1, 128, 128>}]} {
    %c2_i32 = arith.constant 2 : i32
    %0 = arith.remsi %arg1, %c2_i32 : i32
    %c0_i32 = arith.constant 0 : i32
    %1 = arith.cmpi eq, %arg1, %c0_i32 : i32
    %2 = arith.extui %1 : i1 to i32
    %c0_i32_0 = arith.constant 0 : i32
    %3 = arith.cmpi ne, %2, %c0_i32_0 : i32
    scf.if %3 {
      %c18_i32_33 = arith.constant 18 : i32
      %135 = arith.muli %arg0, %c18_i32_33 : i32
      %c0_i32_34 = arith.constant 0 : i32
      %136 = arith.addi %135, %c0_i32_34 : i32
      %c16_i32_35 = arith.constant 16 : i32
      %137 = arith.muli %136, %c16_i32_35 : i32
      %c0_i32_36 = arith.constant 0 : i32
      %c0_i32_37 = arith.constant 0 : i32
      %c0_i32_38 = arith.constant 0 : i32
      %138 = tpu.memref_slice %arg2[%137, %c0_i32_38] : memref<576x128xf32, #tpu.memory_space<any>> -> memref<160x128xf32, #tpu.memory_space<any>>
      %c0_i32_39 = arith.constant 0 : i32
      %c0_i32_40 = arith.constant 0 : i32
      %139 = tpu.memref_slice %arg10[%c0_i32_36, %c0_i32_39, %c0_i32_40] : memref<2x160x128xf32, #tpu.memory_space<vmem>> -> memref<1x160x128xf32, #tpu.memory_space<vmem>>
      %140 = tpu.memref_squeeze %139 : memref<1x160x128xf32, #tpu.memory_space<vmem>> -> memref<160x128xf32, #tpu.memory_space<vmem>>
      %141 = tpu.memref_slice %arg11[%c0_i32_37] : memref<2x!tpu.dma_semaphore, #tpu.memory_space<semaphore_mem>> -> memref<1x!tpu.dma_semaphore, #tpu.memory_space<semaphore_mem>>
      %142 = tpu.memref_squeeze %141 : memref<1x!tpu.dma_semaphore, #tpu.memory_space<semaphore_mem>> -> memref<!tpu.dma_semaphore, #tpu.memory_space<semaphore_mem>>
      tpu.enqueue_dma source(%138 : memref<160x128xf32, #tpu.memory_space<any>>) target(%140 : memref<160x128xf32, #tpu.memory_space<vmem>>) target_semaphore(%142 : memref<!tpu.dma_semaphore, #tpu.memory_space<semaphore_mem>>)
    } else {
    }
    %c18_i32 = arith.constant 18 : i32
    %4 = arith.muli %arg0, %c18_i32 : i32
    %c8_i32 = arith.constant 8 : i32
    %5 = arith.muli %arg1, %c8_i32 : i32
    %6 = arith.addi %4, %5 : i32
    %c16_i32 = arith.constant 16 : i32
    %7 = arith.muli %6, %c16_i32 : i32
    %c0_i32_1 = arith.constant 0 : i32
    %8 = tpu.memref_slice %arg2[%7, %c0_i32_1] : memref<576x128xf32, #tpu.memory_space<any>> -> memref<160x128xf32, #tpu.memory_space<any>>
    %c0_i32_2 = arith.constant 0 : i32
    %c0_i32_3 = arith.constant 0 : i32
    %9 = tpu.memref_slice %arg10[%0, %c0_i32_2, %c0_i32_3] : memref<2x160x128xf32, #tpu.memory_space<vmem>> -> memref<1x160x128xf32, #tpu.memory_space<vmem>>
    %10 = tpu.memref_squeeze %9 : memref<1x160x128xf32, #tpu.memory_space<vmem>> -> memref<160x128xf32, #tpu.memory_space<vmem>>
    %11 = tpu.memref_slice %arg11[%0] : memref<2x!tpu.dma_semaphore, #tpu.memory_space<semaphore_mem>> -> memref<1x!tpu.dma_semaphore, #tpu.memory_space<semaphore_mem>>
    %12 = tpu.memref_squeeze %11 : memref<1x!tpu.dma_semaphore, #tpu.memory_space<semaphore_mem>> -> memref<!tpu.dma_semaphore, #tpu.memory_space<semaphore_mem>>
    tpu.wait_dma2 semaphore(%12 : memref<!tpu.dma_semaphore, #tpu.memory_space<semaphore_mem>>) src(%8 : memref<160x128xf32, #tpu.memory_space<any>>) dst(%10 : memref<160x128xf32, #tpu.memory_space<vmem>>)
    %c1_i32 = arith.constant 1 : i32
    %13 = arith.addi %arg1, %c1_i32 : i32
    %c2_i32_4 = arith.constant 2 : i32
    %14 = arith.cmpi slt, %13, %c2_i32_4 : i32
    %15 = arith.extui %14 : i1 to i32
    %c0_i32_5 = arith.constant 0 : i32
    %16 = arith.cmpi ne, %15, %c0_i32_5 : i32
    scf.if %16 {
      %c1_i32_33 = arith.constant 1 : i32
      %135 = arith.addi %arg1, %c1_i32_33 : i32
      %c1_i32_34 = arith.constant 1 : i32
      %136 = arith.subi %c1_i32_34, %0 : i32
      %c18_i32_35 = arith.constant 18 : i32
      %137 = arith.muli %arg0, %c18_i32_35 : i32
      %c8_i32_36 = arith.constant 8 : i32
      %138 = arith.muli %135, %c8_i32_36 : i32
      %139 = arith.addi %137, %138 : i32
      %c16_i32_37 = arith.constant 16 : i32
      %140 = arith.muli %139, %c16_i32_37 : i32
      %c0_i32_38 = arith.constant 0 : i32
      %141 = tpu.memref_slice %arg2[%140, %c0_i32_38] : memref<576x128xf32, #tpu.memory_space<any>> -> memref<160x128xf32, #tpu.memory_space<any>>
      %c0_i32_39 = arith.constant 0 : i32
      %c0_i32_40 = arith.constant 0 : i32
      %142 = tpu.memref_slice %arg10[%136, %c0_i32_39, %c0_i32_40] : memref<2x160x128xf32, #tpu.memory_space<vmem>> -> memref<1x160x128xf32, #tpu.memory_space<vmem>>
      %143 = tpu.memref_squeeze %142 : memref<1x160x128xf32, #tpu.memory_space<vmem>> -> memref<160x128xf32, #tpu.memory_space<vmem>>
      %144 = tpu.memref_slice %arg11[%136] : memref<2x!tpu.dma_semaphore, #tpu.memory_space<semaphore_mem>> -> memref<1x!tpu.dma_semaphore, #tpu.memory_space<semaphore_mem>>
      %145 = tpu.memref_squeeze %144 : memref<1x!tpu.dma_semaphore, #tpu.memory_space<semaphore_mem>> -> memref<!tpu.dma_semaphore, #tpu.memory_space<semaphore_mem>>
      tpu.enqueue_dma source(%141 : memref<160x128xf32, #tpu.memory_space<any>>) target(%143 : memref<160x128xf32, #tpu.memory_space<vmem>>) target_semaphore(%145 : memref<!tpu.dma_semaphore, #tpu.memory_space<semaphore_mem>>)
    } else {
    }
    %17 = arith.index_cast %0 : i32 to index
    %c0 = arith.constant 0 : index
    %c0_6 = arith.constant 0 : index
    %18 = vector.load %arg10[%17, %c0, %c0_6] : memref<2x160x128xf32, #tpu.memory_space<vmem>>, vector<1x160x128xf32>
    %19 = vector.shape_cast %18 : vector<1x160x128xf32> to vector<160x128xf32>
    %20 = arith.truncf %19 : vector<160x128xf32> to vector<160x128xbf16>
    %c0_7 = arith.constant 0 : index
    %c0_8 = arith.constant 0 : index
    %21 = vector.load %arg3[%c0_7, %c0_8] : memref<128x128xbf16, #tpu.memory_space<vmem>>, vector<128x128xbf16>
    %cst = arith.constant dense<0.000000e+00> : vector<160x128xf32>
    %22 = tpu.matmul %20, %21, %cst {dimension_numbers = #tpu.dot_dimension_numbers<[1], [0], [0], [1], [0, 0, 1, 1], [], []>} : vector<160x128xbf16>, vector<128x128xbf16>, vector<160x128xf32> -> vector<160x128xf32>
    %23 = vector.shape_cast %22 : vector<160x128xf32> to vector<10x16x128xf32>
    %24 = tpu.iota {dimensions = array<i32: 0>} : vector<10x1x1xi32>
    %c8_i32_9 = arith.constant 8 : i32
    %25 = arith.muli %arg1, %c8_i32_9 : i32
    %c1_i32_10 = arith.constant 1 : i32
    %26 = arith.subi %25, %c1_i32_10 : i32
    %27 = vector.broadcast %26 : i32 to vector<10x1x1xi32>
    %28 = arith.addi %27, %24 : vector<10x1x1xi32>
    %c0_i32_11 = arith.constant 0 : i32
    %29 = vector.broadcast %c0_i32_11 : i32 to vector<10x1x1xi32>
    %30 = arith.cmpi sge, %28, %29 : vector<10x1x1xi32>
    %c16_i32_12 = arith.constant 16 : i32
    %31 = vector.broadcast %c16_i32_12 : i32 to vector<10x1x1xi32>
    %32 = arith.cmpi slt, %28, %31 : vector<10x1x1xi32>
    %33 = arith.andi %30, %32 : vector<10x1x1xi1>
    %34 = arith.extui %33 : vector<10x1x1xi1> to vector<10x1x1xi32>
    %35 = arith.sitofp %34 : vector<10x1x1xi32> to vector<10x1x1xf32>
    %c0_13 = arith.constant 0 : index
    %c0_14 = arith.constant 0 : index
    %36 = vector.load %arg4[%c0_13, %c0_14] : memref<1x128xf32, #tpu.memory_space<vmem>>, vector<1x128xf32>
    %37 = vector.shape_cast %36 : vector<1x128xf32> to vector<1x1x128xf32>
    %38 = vector.broadcast %37 : vector<1x1x128xf32> to vector<10x1x128xf32>
    %39 = vector.broadcast %35 : vector<10x1x1xf32> to vector<10x1x128xf32>
    %40 = arith.mulf %38, %39 : vector<10x1x128xf32>
    %41 = vector.broadcast %40 : vector<10x1x128xf32> to vector<10x16x128xf32>
    %42 = arith.addf %23, %41 : vector<10x16x128xf32>
    %cst_15 = arith.constant 0.000000e+00 : f32
    %cst_16 = arith.constant 6.000000e+00 : f32
    %43 = vector.broadcast %cst_15 : f32 to vector<10x16x128xf32>
    %44 = arith.maximumf %43, %42 : vector<10x16x128xf32>
    %45 = vector.broadcast %cst_16 : f32 to vector<10x16x128xf32>
    %46 = arith.minimumf %45, %44 : vector<10x16x128xf32>
    %c0_17 = arith.constant 0 : index
    %c0_18 = arith.constant 0 : index
    %c0_19 = arith.constant 0 : index
    %47 = vector.load %arg5[%c0_17, %c0_18, %c0_19] : memref<3x3x128xf32, #tpu.memory_space<vmem>>, vector<3x3x128xf32>
    %cst_20 = arith.constant 0.000000e+00 : f32
    %48 = vector.broadcast %cst_20 : f32 to vector<10x1x128xf32>
    %49 = vector.extract_strided_slice %46 {offsets = [0, 0, 0], sizes = [10, 15, 128], strides = [1, 1, 1]} : vector<10x16x128xf32> to vector<10x15x128xf32>
    %50 = tpu.concatenate %48, %49 in 1 : vector<10x1x128xf32>, vector<10x15x128xf32> -> vector<10x16x128xf32>
    %51 = vector.extract_strided_slice %46 {offsets = [0, 1, 0], sizes = [10, 15, 128], strides = [1, 1, 1]} : vector<10x16x128xf32> to vector<10x15x128xf32>
    %52 = tpu.concatenate %51, %48 in 1 : vector<10x15x128xf32>, vector<10x1x128xf32> -> vector<10x16x128xf32>
    %53 = vector.extract_strided_slice %50 {offsets = [0, 0, 0], sizes = [8, 16, 128], strides = [1, 1, 1]} : vector<10x16x128xf32> to vector<8x16x128xf32>
    %54 = vector.extract_strided_slice %47 {offsets = [0, 0, 0], sizes = [1, 1, 128], strides = [1, 1, 1]} : vector<3x3x128xf32> to vector<1x1x128xf32>
    %55 = vector.shape_cast %54 : vector<1x1x128xf32> to vector<128xf32>
    %56 = vector.shape_cast %55 : vector<128xf32> to vector<1x1x128xf32>
    %57 = vector.broadcast %56 : vector<1x1x128xf32> to vector<8x16x128xf32>
    %58 = arith.mulf %53, %57 : vector<8x16x128xf32>
    %59 = vector.extract_strided_slice %46 {offsets = [0, 0, 0], sizes = [8, 16, 128], strides = [1, 1, 1]} : vector<10x16x128xf32> to vector<8x16x128xf32>
    %60 = vector.extract_strided_slice %47 {offsets = [0, 1, 0], sizes = [1, 1, 128], strides = [1, 1, 1]} : vector<3x3x128xf32> to vector<1x1x128xf32>
    %61 = vector.shape_cast %60 : vector<1x1x128xf32> to vector<128xf32>
    %62 = vector.shape_cast %61 : vector<128xf32> to vector<1x1x128xf32>
    %63 = vector.broadcast %62 : vector<1x1x128xf32> to vector<8x16x128xf32>
    %64 = arith.mulf %59, %63 : vector<8x16x128xf32>
    %65 = arith.addf %58, %64 : vector<8x16x128xf32>
    %66 = vector.extract_strided_slice %52 {offsets = [0, 0, 0], sizes = [8, 16, 128], strides = [1, 1, 1]} : vector<10x16x128xf32> to vector<8x16x128xf32>
    %67 = vector.extract_strided_slice %47 {offsets = [0, 2, 0], sizes = [1, 1, 128], strides = [1, 1, 1]} : vector<3x3x128xf32> to vector<1x1x128xf32>
    %68 = vector.shape_cast %67 : vector<1x1x128xf32> to vector<128xf32>
    %69 = vector.shape_cast %68 : vector<128xf32> to vector<1x1x128xf32>
    %70 = vector.broadcast %69 : vector<1x1x128xf32> to vector<8x16x128xf32>
    %71 = arith.mulf %66, %70 : vector<8x16x128xf32>
    %72 = arith.addf %65, %71 : vector<8x16x128xf32>
    %73 = vector.extract_strided_slice %50 {offsets = [1, 0, 0], sizes = [8, 16, 128], strides = [1, 1, 1]} : vector<10x16x128xf32> to vector<8x16x128xf32>
    %74 = vector.extract_strided_slice %47 {offsets = [1, 0, 0], sizes = [1, 1, 128], strides = [1, 1, 1]} : vector<3x3x128xf32> to vector<1x1x128xf32>
    %75 = vector.shape_cast %74 : vector<1x1x128xf32> to vector<128xf32>
    %76 = vector.shape_cast %75 : vector<128xf32> to vector<1x1x128xf32>
    %77 = vector.broadcast %76 : vector<1x1x128xf32> to vector<8x16x128xf32>
    %78 = arith.mulf %73, %77 : vector<8x16x128xf32>
    %79 = arith.addf %72, %78 : vector<8x16x128xf32>
    %80 = vector.extract_strided_slice %46 {offsets = [1, 0, 0], sizes = [8, 16, 128], strides = [1, 1, 1]} : vector<10x16x128xf32> to vector<8x16x128xf32>
    %81 = vector.extract_strided_slice %47 {offsets = [1, 1, 0], sizes = [1, 1, 128], strides = [1, 1, 1]} : vector<3x3x128xf32> to vector<1x1x128xf32>
    %82 = vector.shape_cast %81 : vector<1x1x128xf32> to vector<128xf32>
    %83 = vector.shape_cast %82 : vector<128xf32> to vector<1x1x128xf32>
    %84 = vector.broadcast %83 : vector<1x1x128xf32> to vector<8x16x128xf32>
    %85 = arith.mulf %80, %84 : vector<8x16x128xf32>
    %86 = arith.addf %79, %85 : vector<8x16x128xf32>
    %87 = vector.extract_strided_slice %52 {offsets = [1, 0, 0], sizes = [8, 16, 128], strides = [1, 1, 1]} : vector<10x16x128xf32> to vector<8x16x128xf32>
    %88 = vector.extract_strided_slice %47 {offsets = [1, 2, 0], sizes = [1, 1, 128], strides = [1, 1, 1]} : vector<3x3x128xf32> to vector<1x1x128xf32>
    %89 = vector.shape_cast %88 : vector<1x1x128xf32> to vector<128xf32>
    %90 = vector.shape_cast %89 : vector<128xf32> to vector<1x1x128xf32>
    %91 = vector.broadcast %90 : vector<1x1x128xf32> to vector<8x16x128xf32>
    %92 = arith.mulf %87, %91 : vector<8x16x128xf32>
    %93 = arith.addf %86, %92 : vector<8x16x128xf32>
    %94 = vector.extract_strided_slice %50 {offsets = [2, 0, 0], sizes = [8, 16, 128], strides = [1, 1, 1]} : vector<10x16x128xf32> to vector<8x16x128xf32>
    %95 = vector.extract_strided_slice %47 {offsets = [2, 0, 0], sizes = [1, 1, 128], strides = [1, 1, 1]} : vector<3x3x128xf32> to vector<1x1x128xf32>
    %96 = vector.shape_cast %95 : vector<1x1x128xf32> to vector<128xf32>
    %97 = vector.shape_cast %96 : vector<128xf32> to vector<1x1x128xf32>
    %98 = vector.broadcast %97 : vector<1x1x128xf32> to vector<8x16x128xf32>
    %99 = arith.mulf %94, %98 : vector<8x16x128xf32>
    %100 = arith.addf %93, %99 : vector<8x16x128xf32>
    %101 = vector.extract_strided_slice %46 {offsets = [2, 0, 0], sizes = [8, 16, 128], strides = [1, 1, 1]} : vector<10x16x128xf32> to vector<8x16x128xf32>
    %102 = vector.extract_strided_slice %47 {offsets = [2, 1, 0], sizes = [1, 1, 128], strides = [1, 1, 1]} : vector<3x3x128xf32> to vector<1x1x128xf32>
    %103 = vector.shape_cast %102 : vector<1x1x128xf32> to vector<128xf32>
    %104 = vector.shape_cast %103 : vector<128xf32> to vector<1x1x128xf32>
    %105 = vector.broadcast %104 : vector<1x1x128xf32> to vector<8x16x128xf32>
    %106 = arith.mulf %101, %105 : vector<8x16x128xf32>
    %107 = arith.addf %100, %106 : vector<8x16x128xf32>
    %108 = vector.extract_strided_slice %52 {offsets = [2, 0, 0], sizes = [8, 16, 128], strides = [1, 1, 1]} : vector<10x16x128xf32> to vector<8x16x128xf32>
    %109 = vector.extract_strided_slice %47 {offsets = [2, 2, 0], sizes = [1, 1, 128], strides = [1, 1, 1]} : vector<3x3x128xf32> to vector<1x1x128xf32>
    %110 = vector.shape_cast %109 : vector<1x1x128xf32> to vector<128xf32>
    %111 = vector.shape_cast %110 : vector<128xf32> to vector<1x1x128xf32>
    %112 = vector.broadcast %111 : vector<1x1x128xf32> to vector<8x16x128xf32>
    %113 = arith.mulf %108, %112 : vector<8x16x128xf32>
    %114 = arith.addf %107, %113 : vector<8x16x128xf32>
    %c0_21 = arith.constant 0 : index
    %c0_22 = arith.constant 0 : index
    %115 = vector.load %arg6[%c0_21, %c0_22] : memref<1x128xf32, #tpu.memory_space<vmem>>, vector<1x128xf32>
    %116 = vector.shape_cast %115 : vector<1x128xf32> to vector<1x1x128xf32>
    %117 = vector.broadcast %116 : vector<1x1x128xf32> to vector<8x16x128xf32>
    %118 = arith.addf %114, %117 : vector<8x16x128xf32>
    %cst_23 = arith.constant 0.000000e+00 : f32
    %cst_24 = arith.constant 6.000000e+00 : f32
    %119 = vector.broadcast %cst_23 : f32 to vector<8x16x128xf32>
    %120 = arith.maximumf %119, %118 : vector<8x16x128xf32>
    %121 = vector.broadcast %cst_24 : f32 to vector<8x16x128xf32>
    %122 = arith.minimumf %121, %120 : vector<8x16x128xf32>
    %123 = vector.shape_cast %122 : vector<8x16x128xf32> to vector<128x128xf32>
    %124 = arith.truncf %123 : vector<128x128xf32> to vector<128x128xbf16>
    %c0_25 = arith.constant 0 : index
    %c0_26 = arith.constant 0 : index
    %125 = vector.load %arg7[%c0_25, %c0_26] : memref<128x128xbf16, #tpu.memory_space<vmem>>, vector<128x128xbf16>
    %cst_27 = arith.constant dense<0.000000e+00> : vector<128x128xf32>
    %126 = tpu.matmul %124, %125, %cst_27 {dimension_numbers = #tpu.dot_dimension_numbers<[1], [0], [0], [1], [0, 0, 1, 1], [], []>} : vector<128x128xbf16>, vector<128x128xbf16>, vector<128x128xf32> -> vector<128x128xf32>
    %c0_28 = arith.constant 0 : index
    %c0_29 = arith.constant 0 : index
    %127 = vector.load %arg8[%c0_28, %c0_29] : memref<1x128xf32, #tpu.memory_space<vmem>>, vector<1x128xf32>
    %128 = vector.broadcast %127 : vector<1x128xf32> to vector<128x128xf32>
    %129 = arith.addf %126, %128 : vector<128x128xf32>
    %130 = vector.extract_strided_slice %19 {offsets = [16, 0], sizes = [128, 128], strides = [1, 1]} : vector<160x128xf32> to vector<128x128xf32>
    %131 = arith.addf %129, %130 : vector<128x128xf32>
    %c0_30 = arith.constant 0 : index
    %c0_31 = arith.constant 0 : index
    %c0_32 = arith.constant 0 : index
    %132 = vector.load %arg9[%c0_30, %c0_31, %c0_32] : memref<1x128x128xf32, #tpu.memory_space<vmem>>, vector<1x128x128xf32>
    %133 = vector.shape_cast %132 : vector<1x128x128xf32> to vector<128x128xf32>
    %134 = vector.shape_cast %131 : vector<128x128xf32> to vector<1x128x128xf32>
    tpu.vector_store %arg9[%c0_30, %c0_31, %c0_32], %134 {strides = array<i32>} : memref<1x128x128xf32, #tpu.memory_space<vmem>>, vector<1x128x128xf32>,
    return
  }
  func.func @transform_1(%arg0: i32, %arg1: i32) -> (i32, i32) {
    %c0_i32 = arith.constant 0 : i32
    %c0_i32_0 = arith.constant 0 : i32
    %c0_i32_1 = arith.constant 0 : i32
    return %c0_i32, %c0_i32_0 : i32, i32
  }
  func.func @transform_2(%arg0: i32, %arg1: i32) -> (i32, i32) {
    %c0_i32 = arith.constant 0 : i32
    %c0_i32_0 = arith.constant 0 : i32
    %c0_i32_1 = arith.constant 0 : i32
    return %c0_i32, %c0_i32_0 : i32, i32
  }
  func.func @transform_3(%arg0: i32, %arg1: i32) -> (i32, i32, i32) {
    %c0_i32 = arith.constant 0 : i32
    %c0_i32_0 = arith.constant 0 : i32
    %c0_i32_1 = arith.constant 0 : i32
    %c0_i32_2 = arith.constant 0 : i32
    return %c0_i32, %c0_i32_0, %c0_i32_1 : i32, i32, i32
  }
  func.func @transform_4(%arg0: i32, %arg1: i32) -> (i32, i32) {
    %c0_i32 = arith.constant 0 : i32
    %c0_i32_0 = arith.constant 0 : i32
    %c0_i32_1 = arith.constant 0 : i32
    return %c0_i32, %c0_i32_0 : i32, i32
  }
  func.func @transform_5(%arg0: i32, %arg1: i32) -> (i32, i32) {
    %c0_i32 = arith.constant 0 : i32
    %c0_i32_0 = arith.constant 0 : i32
    %c0_i32_1 = arith.constant 0 : i32
    return %c0_i32, %c0_i32_0 : i32, i32
  }
  func.func @transform_6(%arg0: i32, %arg1: i32) -> (i32, i32) {
    %c0_i32 = arith.constant 0 : i32
    %c0_i32_0 = arith.constant 0 : i32
    %c0_i32_1 = arith.constant 0 : i32
    return %c0_i32, %c0_i32_0 : i32, i32
  }
  func.func @transform_7(%arg0: i32, %arg1: i32) -> (i32, i32, i32) {
    %c0_i32 = arith.constant 0 : i32
    %c0_i32_0 = arith.constant 0 : i32
    return %arg0, %arg1, %c0_i32 : i32, i32, i32
  }
}

</mosaic_0001>

<bundles_post_ra>
// kernel: tpu_custom_call.1
= control target key start
LH: loop header
LB: loop body
LE: loop exit
PB: predicated region body
PF: predicated region fallthrough
CT: control target
= control target key end

     0   :  { %s3272_s0 = inlined_call_operand.hbm [shape: f32[576,128], index: 0, kind: input, shape index: {}]   ;;  %s3273_s1 = inlined_call_operand.hbm [shape: bf16[128,128], index: 1, kind: input, shape index: {}]   ;;  %s3274_s2 = inlined_call_operand.vmem [shape: f32[1,128], index: 2, kind: input, shape index: {}]   ;;  %s3275_s3 = inlined_call_operand.hbm [shape: f32[3,3,128], index: 3, kind: input, shape index: {}]   ;;  %s3276_s4 = inlined_call_operand.vmem [shape: f32[1,128], index: 4, kind: input, shape index: {}]   ;;  %s3277_s5 = inlined_call_operand.hbm [shape: bf16[128,128], index: 5, kind: input, shape index: {}]   ;;  %s3278_s6 = inlined_call_operand.vmem [shape: f32[1,128], index: 6, kind: input, shape index: {}]   ;;  %s3279_s7 = inlined_call_operand.hbm [shape: f32[2,256,128], index: 7, kind: output, shape index: {}]  }
   0x1   :  { %3315 = sst [smem:[#allocation70_spill]] %s3273_s1 }
   0x2   :  { %3316 = sst [smem:[#allocation71_spill]] %s3275_s3 }
   0x3   :  { %12 = vsyncpa [#allocation5], 0 }
   0x4   :  { %13 = vsyncpa [#allocation8], 0 }
   0x5   :  { %14 = vsyncpa [#allocation6], 0 }
   0x6   :  { %16 = vsyncpa [#allocation6 + $0x1], 0  ;;  %s2202_s24 = smov 0   ;;  %s2204_s25 = smov 0  }
   0x7   :  { %s2206_s26 = smov 0   ;;  %s2208_s27 = smov 0  }
   0x8   :  { %s2210_s28 = smov 0   ;;  %s2212_s29 = smov 0  }
   0x9   :  { %s2214_s30 = smov 0   ;;  %s2216_s8 = smov 0  }
   0xa LB: > { %3317 = sst [smem:[#allocation21_spill]] %s2122_s24  ;;  %s1601_s9 = sadd.s32 4294967295, %s2150_s8   ;;  %s2150_s8 = sphi %s2216_s8, %s22_s8   ;;  %s2146_s30 = sphi %s2214_s30, %s3461_s30   ;;  %s2142_s29 = sphi %s2212_s29, %s3460_s29   ;;  %s2138_s28 = sphi %s2210_s28, %s3459_s28   ;;  %s2134_s27 = sphi %s2208_s27, %s3458_s27   ;;  %s2130_s26 = sphi %s2206_s26, %s3457_s26   ;;  %s2126_s25 = sphi %s2204_s25, %s3463_s25   ;;  %s2122_s24 = sphi %s2202_s24, %s3462_s24  }
   0xb   : > { %3318 = sst [smem:[#allocation22_spill]] %s2130_s26  ;;  %s1602_s10 = sadd.s32 4294967294, %s2150_s8  }
   0xc   : > { %3319 = sst [smem:[#allocation23_spill]] %s2142_s29  ;;  %s31_s11 = sadd.s32 1, %s2142_s29 }
   0xd   : > { %3320 = sst [smem:[#allocation24_spill]] %s2146_s30  ;;  %s34_s12 = sadd.s32 1, %s2146_s30 }
   0xe   : > { %p32_p0 = scmp.ge.s32.totalorder %s31_s11, 2  ;;  %s169_s13 = sadd.s32 1, %s2130_s26 }
   0xf   : > { %p179_p1 = scmp.ne.s32.totalorder %s2130_s26, %s2126_s25  ;;  %p180_p2 = scmp.eq.s32.totalorder %s1601_s9, 3 }
  0x10   : > { %s3465_s11 = smov (%p32_p0, %s31_s11), 0  ;;  %s3467_s12 = smov (!%p32_p0, %s34_s12), %s2146_s30 }
  0x11   : > { %3321 = sst [smem:[#allocation25_spill]] %s3465_s11  ;;  %s165_s14 = ssub.s32 %s2142_s29, %s3465_s11 }
  0x12   : > { %p2254_p3 = por %p180_p2, %p179_p1  ;;  %p36_p4 = scmp.ge.s32.totalorder %s3467_s12, 2 }
  0x13   : > { %p185_p5 = scmp.ne.s32.totalorder %s2126_s25, %s2122_s24  ;;  %p186_p6 = scmp.eq.s32.totalorder %s1602_s10, 3 }
  0x14   : > { %s3322_s15 = scalar_select %p2254_p3, 1, 0 }
  0x15   : > { %p1603_p7 = scmp.ge.s32.totalorder %s2150_s8, 1  ;;  %s3469_s12 = smov (%p36_p4, %s3467_s12), 0 }
  0x16   : > { %3323 = sst [smem:[#allocation26_spill]] %s3469_s12  ;;  %p2263_p8 = por %p186_p6, %p185_p5 }
  0x17   : > { %p193_p9 = scmp.lt.s32.totalorder %s2150_s8, 5  ;;  %s164_s17 = ssub.s32 %s2146_s30, %s3469_s12 }
  0x18   : > { %s3324_s16 = scalar_select %p2263_p8, 1, 0 }
  0x19   : > { %s166_s18 = sor.u32 %s165_s14, %s164_s17  ;;  %p2270_p10 = pnand %p1603_p7, %p193_p9 }
  0x1a   : > { %3325 = sst [smem:[#allocation27_spill]] %s3324_s16  ;;  %p167_p11 = scmp.eq.s32.totalorder %s166_s18, 0 }
  0x1b   : > { %s3326_s19 = scalar_select %p2270_p10, 1, 0 }
  0x1c   : > { %p2274_p12 = scmp.eq.s32.totalorder %s1601_s9, 0  ;;  %p1777_p13 = pneg %p2270_p10 }
  0x1d   : > { %s2281_s21 = scalar_select %p167_p11, %s2130_s26, %s169_s13  }
  0x1e   : > { %s3327_s20 = scalar_select %p2274_p12, 1, 0 }
  0x1f   : > { %3328 = sst [smem:[#allocation28_spill]] %s2281_s21  ;;  %p2285_p0 = pnand %p2274_p12, %p1777_p13 }
  0x20   : > { %s2152_s23 = smov [#allocation7]   ;;  %s3330_s3 = sld [smem:[#allocation71_spill]] }
  0x21   : > { %s221_s10 = sshll.u32 %s2152_s23, 4  ;;  %p2297_p2 = pneg %p2285_p0  ;;  %s222_s10 = int_to_ptr.vmem [resolvable:$true] %s221_s10 }
  0x26   : > { %s1905_s9 = scalar_lea.hbm %s3330_s3, 192 }
  0x27   : > { %p1906_p1 = scmp.ne.s32.totalorder %s3330_s3, %s1905_s9  ;;  %p1912_p6 = scmp.lt.u32.totalorder %s1905_s9, %s3330_s3 }
  0x29   : > { %p1908_p4 = pnand %p2297_p2, %p1906_p1 }
  0x2b   : > { %p1909_p5 = pneg %p1908_p4 }
  0x2d   : > { %p1914_p7 = pnand %p1912_p6, %p1909_p5 }
  0x2f   : > { %1917 = shalt.err (!%p1914_p7)
}
  0x30   : > { %s1918_s14 = scalar_lea.vmem %s222_s10, 192  ;;  %p1926_p8 = scmp.lt.s32.totalorder %s222_s10, %s222_s10 }
  0x31   : > { %p1919_p9 = scmp.ne.s32.totalorder %s222_s10, %s1918_s14  ;;  %p1927_p3 = scmp.lt.s32.totalorder %s1918_s14, %s1918_s14 }
  0x33   : > { %p1921_p11 = pnand %p1919_p9, %p2297_p2  ;;  %p1928_p12 = por %p1927_p3, %p1926_p8 }
  0x35   : > { %p1922_p13 = pneg %p1921_p11 }
  0x37   : > { %p1929_p10 = pnand %p1928_p12, %p1922_p13 }
  0x39   : > { %1932 = shalt.err (!%p1929_p10)
}
  0x3a   : > { %s2153_s12 = smov 64   ;;  %s2154_s17 = smov 4  }
  0x3b   : > { %1783 = dma.hbm_to_vmem [thread:$0]  (!%p2285_p0), %s3330_s3, 192, %s222_s10, [#allocation8], %s2153_s12, %s2153_s12, %s2154_s17  }
  0x3c   : > { %s2155_s18 = smov [#allocation4]   ;;  %s2156_s30 = smov [#allocation9]  }
  0x3d   : > { %s205_s23 = sshll.u32 %s2155_s18, 4  ;;  %s237_s29 = sshll.u32 %s2156_s30, 4  ;;  %s206_s23 = int_to_ptr.vmem [resolvable:$true] %s205_s23  ;;  %s2316_s29 = int_to_ptr.vmem [resolvable:$true] %s237_s29 }
  0x3e   : > { %s3332_s1 = sld [smem:[#allocation70_spill]] }
  0x44   : > { %s1933_s26 = scalar_lea.hbm %s3332_s1, 1024 }
  0x45   : > { %p1934_p3 = scmp.ne.s32.totalorder %s3332_s1, %s1933_s26  ;;  %p1940_p12 = scmp.lt.u32.totalorder %s1933_s26, %s3332_s1 }
  0x47   : > { %p1936_p8 = pnand %p1934_p3, %p2297_p2 }
  0x49   : > { %p1937_p10 = pneg %p1936_p8 }
  0x4b   : > { %p1942_p1 = pnand %p1940_p12, %p1937_p10 }
  0x4d   : > { %1945 = shalt.err (!%p1942_p1)
}
  0x4e   : > { %s1946_s30 = scalar_lea.vmem %s206_s23, 1024  ;;  %p1954_p7 = scmp.lt.s32.totalorder %s206_s23, %s206_s23 }
  0x4f   : > { %p1947_p4 = scmp.ne.s32.totalorder %s206_s23, %s1946_s30  ;;  %p1955_p9 = scmp.lt.s32.totalorder %s1946_s30, %s1946_s30 }
  0x51   : > { %p1949_p5 = pnand %p1947_p4, %p2297_p2  ;;  %p1956_p11 = por %p1955_p9, %p1954_p7 }
  0x53   : > { %p1950_p6 = pneg %p1949_p5 }
  0x55   : > { %p1957_p13 = pnand %p1956_p11, %p1950_p6 }
  0x57   : > { %1960 = shalt.err (!%p1957_p13)
}
  0x58   : > { %1780 = dma.hbm_to_vmem [thread:$0]  (!%p2285_p0), %s3332_s1, 1024, %s206_s23, [#allocation5], %s2153_s12, %s2153_s12, %s2154_s17  }
  0x59   : > { %s1961_s9 = scalar_lea.hbm %s3277_s5, 1024 }
  0x5a   : > { %p1962_p3 = scmp.ne.s32.totalorder %s3277_s5, %s1961_s9  ;;  %p1968_p12 = scmp.lt.u32.totalorder %s1961_s9, %s3277_s5 }
  0x5c   : > { %p1964_p8 = pnand %p1962_p3, %p2297_p2 }
  0x5e   : > { %p1965_p10 = pneg %p1964_p8 }
  0x60   : > { %p1970_p1 = pnand %p1968_p12, %p1965_p10 }
  0x62   : > { %1973 = shalt.err (!%p1970_p1)
}
  0x63   : > { %s1974_s23 = scalar_lea.vmem %s2316_s29, 1024  ;;  %p1982_p7 = scmp.lt.s32.totalorder %s2316_s29, %s2316_s29 }
  0x64   : > { %p1975_p4 = scmp.ne.s32.totalorder %s2316_s29, %s1974_s23  ;;  %p1983_p9 = scmp.lt.s32.totalorder %s1974_s23, %s1974_s23 }
  0x66   : > { %p1977_p5 = pnand %p1975_p4, %p2297_p2  ;;  %p1984_p11 = por %p1983_p9, %p1982_p7 }
  0x68   : > { %p1978_p6 = pneg %p1977_p5 }
  0x6a   : > { %p1985_p13 = pnand %p1984_p11, %p1978_p6 }
  0x6c   : > { %1988 = shalt.err (!%p1985_p13)
}
  0x6d   : > { %1786 = dma.hbm_to_vmem [thread:$0]  (!%p2285_p0), %s3277_s5, 1024, %s2316_s29, [#allocation8], %s2153_s12, %s2153_s12, %s2154_s17  }
  0x6e   : > { %p3333_p3 = scmp.ne.s32.totalorder %s3326_s19, 0 }
  0x70   : > { %256 = sbr.rel (%p3333_p3) target bundleno = 793 (0x319), region = 44 }
  0x77   : > { %p3334_p2 = scmp.ne.s32.totalorder %s3327_s20, 0 }
  0x79   : > { %2107 = dma.done.wait (%p3334_p2), [#allocation5], 1024  }
  0x7a   : > { %2109 = vsyncadd (%p3334_p2), [#allocation5], 4294966272 }
  0x7b   : > { %2111 = dma.done.wait (%p3334_p2), [#allocation8], 1216  }
  0x7c   : > { %2113 = vsyncadd (%p3334_p2), [#allocation8], 4294966080  ;;  %s3291_s29 = sand.u32 1, %s2126_s25   ;;  %p291_p0 = scmp.lt.s32.totalorder %s2134_s27, 0 }
  0x7d   : > { %s2379_s19 = sshll.u32 %s3291_s29, 7  ;;  %s292_s22 = ssub.s32 0, %s2134_s27 }
  0x7e   : > { %s1612_s13 = smin.u32 %s2134_s27, %s292_s22  ;;  %p1797_p8 = scmp.eq.s32.totalorder %s2134_s27, 0 }
  0x7f   : > { %s294_s12 = sand.u32 1, %s1612_s13   ;;  %s1656_s20 = smul.u32 4608, %s2138_s28 }
  0x80   : > { %s295_s17 = ssub.s32 0, %s294_s12  ;;  %s2157_s26 = smov [#allocation2]  }
  0x81   : > { %s3471_s17 = smov (!%p291_p0, %s295_s17), %s294_s12  ;;  %s311_s16 = sshll.u32 %s2157_s26, 4  ;;  %s2391_s16 = int_to_ptr.vmem [resolvable:$true] %s311_s16 }
  0x82   : > { %s1615_s21 = sshll.u32 %s2134_s27, 3  ;;  %s303_s14 = scalar_lea.hbm %s3272_s0, %s1656_s20 }
  0x83   : > { %s1989_s11 = scalar_lea.hbm %s303_s14, 2560  ;;  %s3293_s30 = scalar_lea.hbm %s3272_s0, 9216 }
  0x84   : > { %p1990_p10 = scmp.ne.s32.totalorder %s303_s14, %s1989_s11  ;;  %p1994_p4 = scmp.lt.u32.totalorder %s303_s14, %s3272_s0 }
  0x85   : > { %p1995_p5 = scmp.lt.u32.totalorder %s3293_s30, %s1989_s11  ;;  %p1997_p7 = scmp.lt.u32.totalorder %s1989_s11, %s303_s14 }
  0x86   : > { %p1991_p12 = pnand %p1990_p10, %p1797_p8 }
  0x87   : > { %p1996_p6 = por %p1995_p5, %p1994_p4 }
  0x88   : > { %p1992_p1 = pneg %p1991_p12 }
  0x89   : > { %p1998_p9 = por %p1997_p7, %p1996_p6 }
  0x8b   : > { %p1999_p11 = pnand %p1998_p9, %p1992_p1 }
  0x8d   : > { %2002 = shalt.err (!%p1999_p11)  }
  0x8e   : > { %s2003_s20 = scalar_lea.vmem %s2391_s16, 2560  ;;  %s3292_s26 = scalar_lea.vmem %s2391_s16, 5120 }
  0x8f   : > { %p2004_p13 = scmp.ne.s32.totalorder %s2391_s16, %s2003_s20  ;;  %p2010_p0 = scmp.lt.s32.totalorder %s2391_s16, %s2391_s16 }
  0x90   : > { %p2011_p10 = scmp.lt.s32.totalorder %s3292_s26, %s2003_s20 }
  0x91   : > { %p2005_p3 = pnand %p2004_p13, %p1797_p8 }
  0x92   : > { %p2012_p12 = por %p2011_p10, %p2010_p0 }
  0x93   : > { %p2006_p2 = pneg %p2005_p3 }
  0x95   : > { %p2013_p4 = pnand %p2012_p12, %p2006_p2 }
  0x97   : > { %2016 = shalt.err (!%p2013_p4)  }
  0x98   : > { %1772 = dma.hbm_to_vmem [thread:$0]  (%p1797_p8), %s303_s14, 2560, %s2391_s16, [#allocation3] }
  0x99   : > { %s317_s9 = smul.u32 160, %s3471_s17  ;;  %s2419_s18 = scalar_lea.vmem [#allocation10], %s2379_s19 }
  0x9a   : > { %s319_s10 = scalar_lea.sflag [#allocation3], %s3471_s17 }
  0x9b   : > { %s2421_s11 = scalar_lea.vmem [#allocation2], %s317_s9 }
  0x9c   : > { %2114 = dma.done.wait %s319_s10, 2560 }
  0x9d   : > { %2115 = vsyncadd %s319_s10, 4294964736  ;;  %s323_s23 = sadd.s32 1, %s2134_s27  ;;  %s328_s24 = ssub.s32 1, %s3471_s17  ;;  %v1873_v0 = vld [vmem:[#allocation4] sm:$0xff]   ;;  %v1874_v1 = vld [vmem:[#allocation4 + $0x8] sm:$0xff]  }
  0x9e   : > { %s1528_s22 = smul.u32 18, %s2138_s28  ;;  %p2427_p1 = scmp.lt.s32.totalorder %s323_s23, 2 }
  0x9f   : > { %s334_s14 = smul.u32 160, %s328_s24  ;;  %s336_s17 = scalar_lea.sflag [#allocation3], %s328_s24 }
  0xa0   : > { %s1530_s19 = sadd.s32 %s1615_s21, %s1528_s22 }
  0xa1   : > { %s1618_s12 = sshll.u32 %s1530_s19, 8  ;;  %s335_s29 = scalar_lea.vmem [#allocation2], %s334_s14 }
  0xa2   : > { %s1532_s10 = scalar_lea.hbm %s3272_s0, %s1618_s12  ;;  %s344_s26 = sshll.u32 %s335_s29, 4  ;;  %s345_s26 = int_to_ptr.vmem [resolvable:$true] %s344_s26 }
  0xa3   : > { %s1533_s30 = scalar_lea.hbm %s1532_s10, 2048  ;;  %s2045_s23 = scalar_lea.hbm %s1532_s10, 4608 }
  0xa4   : > { %p2018_p8 = scmp.ne.s32.totalorder %s1533_s30, %s2045_s23  ;;  %p2022_p7 = scmp.lt.u32.totalorder %s1533_s30, %s3272_s0 }
  0xa5   : > { %s3336_s12 = scalar_lea.hbm %s3272_s0, 9216  ;;  %p2025_p13 = scmp.lt.u32.totalorder %s2045_s23, %s1533_s30 }
  0xa6   : > { %p2019_p5 = pnand %p2018_p8, %p2427_p1  ;;  %p2023_p9 = scmp.lt.u32.totalorder %s3336_s12, %s2045_s23 }
  0xa8   : > { %p2020_p6 = pneg %p2019_p5  ;;  %p2024_p11 = por %p2023_p9, %p2022_p7 }
  0xaa   : > { %p2026_p3 = por %p2025_p13, %p2024_p11 }
  0xac   : > { %p2027_p2 = pnand %p2026_p3, %p2020_p6 }
  0xae   : > { %2030 = shalt.err (!%p2027_p2)  }
  0xaf   : > { %s2031_s29 = scalar_lea.vmem %s345_s26, 2560  ;;  %p2038_p4 = scmp.lt.s32.totalorder %s345_s26, %s2391_s16 }
  0xb0   : > { %p2032_p0 = scmp.ne.s32.totalorder %s345_s26, %s2031_s29  ;;  %s3337_s1 = scalar_lea.vmem %s2391_s16, 5120 }
  0xb1   : > { %p2039_p8 = scmp.lt.s32.totalorder %s3337_s1, %s2031_s29 }
  0xb2   : > { %p2033_p10 = pnand %p2032_p0, %p2427_p1 }
  0xb3   : > { %p2040_p5 = por %p2039_p8, %p2038_p4 }
  0xb4   : > { %p2034_p12 = pneg %p2033_p10 }
  0xb6   : > { %p2041_p7 = pnand %p2040_p5, %p2034_p12 }
  0xb8   : > { %2044 = shalt.err (!%p2041_p7)  }
  0xb9   : > { %1774 = dma.hbm_to_vmem [thread:$0]  (%p2427_p1), %s1533_s30, 2560, %s345_s26, %s336_s17  ;;  %1691 = vmatprep.subr.bf16.mxu0 %v1873_v0  ;;  %v1875_v2 = vld [vmem:[#allocation4 + $0x10] sm:$0xff]   ;;  %v1876_v3 = vld [vmem:[#allocation4 + $0x18] sm:$0xff]   ;;  %v1877_v7 = vld [vmem:[#allocation4 + $0x20] sm:$0xff]   ;;  %v637_v49 = vlaneseq  ;;  %v2158_v53 = vmov 0.0  }
  0xba   : > { %1692 = vmatpush3.bf16.msra.mxu0 %v1873_v0  ;;  %v348_v4 = vld [vmem:[%s2421_s11] sm:$0xff]  ;;  %v349_v5 = vld [vmem:[%s2421_s11 + $0x8] sm:$0xff]  ;;  %v1879_v9 = vld [vmem:[#allocation4 + $0x30] sm:$0xff]   ;;  %s1627_s3 = sadd.s32 4294967295, %s1615_s21  ;;  %s1649_s14 = sshll.u32 %s2134_s27, 4 }
  0xbb   : > { %1693 = vmatprep.subr.bf16.mxu0 %v1874_v1  ;;  %v368_v6 = vpack.c.bf16 %v349_v5, %v348_v4  ;;  %v1878_v8 = vld [vmem:[#allocation4 + $0x28] sm:$0xff]   ;;  %v1880_v10 = vld [vmem:[#allocation4 + $0x38] sm:$0xff]   ;;  %v350_v11 = vld [vmem:[%s2421_s11 + $0x10] sm:$0xff]  ;;  %v556_v46 = vstv %s1627_s3  ;;  %v638_v56 = vshrl.u32 %v637_v49, 7  ;;  %s1650_s20 = sshll.u32 %s2138_s28, 5  ;;  %s1479_s27 = sshll.u32 %s2419_s18, 4  ;;  %s3207_s27 = int_to_ptr.vmem [resolvable:$true] %s1479_s27 }
  0xbc   : > { %v351_v12 = vld [vmem:[%s2421_s11 + $0x18] sm:$0xff]  ;;  %v352_v13 = vld [vmem:[%s2421_s11 + $0x20] sm:$0xff]  ;;  %v353_v14 = vld [vmem:[%s2421_s11 + $0x28] sm:$0xff]  ;;  %v557_v47 = vadd.s32 1, %v556_v46  ;;  %vm566_vm2 = vcmp.ge.s32.totalorder %v556_v46, 0  ;;  %vm576_vm3 = vcmp.lt.s32.totalorder %v556_v46, 16  ;;  %s1476_s9 = sadd.s32 %s1650_s20, %s1649_s14 }
  0xbd   : > { %1707 = vmatprep.mubr.bf16.mxu0 %v368_v6  ;;  %v369_v15 = vpack.c.bf16 %v351_v12, %v350_v11  ;;  %v370_v16 = vpack.c.bf16 %v353_v14, %v352_v13  ;;  %v354_v17 = vld [vmem:[%s2421_s11 + $0x30] sm:$0xff]  ;;  %v355_v18 = vld [vmem:[%s2421_s11 + $0x38] sm:$0xff]  ;;  %v356_v19 = vld [vmem:[%s2421_s11 + $0x40] sm:$0xff]  ;;  %v559_v48 = vadd.s32 3, %v556_v46  ;;  %v558_v50 = vadd.s32 2, %v556_v46  ;;  %s1651_s28 = sshll.u32 %s1476_s9, 7 }
  0xbe   : > { %1694 = vmatpush3.bf16.msra.mxu0 %v1874_v1  ;;  %v357_v20 = vld [vmem:[%s2421_s11 + $0x48] sm:$0xff]  ;;  %v371_v21 = vpack.c.bf16 %v355_v18, %v354_v17  ;;  %v358_v23 = vld [vmem:[%s2421_s11 + $0x50] sm:$0xff]  ;;  %v359_v24 = vld [vmem:[%s2421_s11 + $0x58] sm:$0xff]  ;;  %vm567_vm0 = vcmp.ge.s32.totalorder %v557_v47, 0  ;;  %vm577_vm1 = vcmp.lt.s32.totalorder %v557_v47, 16  ;;  %v561_v51 = vadd.s32 5, %v556_v46  ;;  %s3214_s23 = scalar_lea.hbm %s3279_s7, %s1651_s28 }
  0xbf   : > { %1695 = vmatprep.subr.bf16.mxu0 %v1875_v2  ;;  %v372_v22 = vpack.c.bf16 %v357_v20, %v356_v19  ;;  %v360_v25 = vld [vmem:[%s2421_s11 + $0x60] sm:$0xff]  ;;  %v361_v26 = vld [vmem:[%s2421_s11 + $0x68] sm:$0xff]  ;;  %v373_v27 = vpack.c.bf16 %v359_v24, %v358_v23  ;;  %v362_v29 = vld [vmem:[%s2421_s11 + $0x70] sm:$0xff]  ;;  %vm569_vm6 = vcmp.ge.s32.totalorder %v559_v48, 0  ;;  %vm579_vm7 = vcmp.lt.s32.totalorder %v559_v48, 16  ;;  %s3451_s22 = sand.u32 1, %s2126_s25  }
  0xc0   : > { %v374_v28 = vpack.c.bf16 %v361_v26, %v360_v25  ;;  %v363_v30 = vld [vmem:[%s2421_s11 + $0x78] sm:$0xff]  ;;  %v364_v31 = vld [vmem:[%s2421_s11 + $0x80] sm:$0xff]  ;;  %v365_v32 = vld [vmem:[%s2421_s11 + $0x88] sm:$0xff]  ;;  %v560_v52 = vadd.s32 4, %v556_v46  ;;  %v563_v57 = vadd.s32 7, %v556_v46  ;;  %vm568_vm8 = vcmp.ge.s32.totalorder %v558_v50, 0 }
  0xc1   : > { %v375_v33 = vpack.c.bf16 %v363_v30, %v362_v29  ;;  %v376_v34 = vpack.c.bf16 %v365_v32, %v364_v31  ;;  %v366_v35 = vld [vmem:[%s2421_s11 + $0x90] sm:$0xff]  ;;  %v367_v36 = vld [vmem:[%s2421_s11 + $0x98] sm:$0xff]  ;;  %v1884_v41 = vld [vmem:[#allocation9 + $0x18] sm:$0xff]   ;;  %vm578_vm9 = vcmp.lt.s32.totalorder %v558_v50, 16  ;;  %v562_v59 = vadd.s32 6, %v556_v46  ;;  %s3220_s19 = scalar_lea.sflag [#allocation6], %s3451_s22 }
  0xc2   : > { %1696 = vmatpush3.bf16.msra.mxu0 %v1875_v2  ;;  %v377_v37 = vpack.c.bf16 %v367_v36, %v366_v35  ;;  %v1881_v38 = vld [vmem:[#allocation9] sm:$0xff]   ;;  %v1882_v39 = vld [vmem:[#allocation9 + $0x8] sm:$0xff]   ;;  %v1883_v40 = vld [vmem:[#allocation9 + $0x10] sm:$0xff]   ;;  %vm571_vm11 = vcmp.ge.s32.totalorder %v561_v51, 0  ;;  %vm581_vm12 = vcmp.lt.s32.totalorder %v561_v51, 16  ;;  %v565_v60 = vadd.s32 9, %v556_v46 }
  0xc3   : > { %1697 = vmatprep.subr.bf16.mxu0 %v1876_v3  ;;  %1727 = vmatprep.subr.bf16.mxu1 %v1881_v38  ;;  %v1885_v42 = vld [vmem:[#allocation9 + $0x20] sm:$0xff]   ;;  %v1886_v43 = vld [vmem:[#allocation9 + $0x28] sm:$0xff]   ;;  %v1887_v44 = vld [vmem:[#allocation9 + $0x30] sm:$0xff]   ;;  %vm570_vm13 = vcmp.ge.s32.totalorder %v560_v52, 0  ;;  %vm580_vm14 = vcmp.lt.s32.totalorder %v560_v52, 16  ;;  %v564_v62 = vadd.s32 8, %v556_v46 }
  0xc4   : > { %1728 = vmatpush3.bf16.msra.mxu1 %v1881_v38  ;;  %v1888_v45 = vld [vmem:[#allocation9 + $0x38] sm:$0xff]   ;;  %vm587_vm4 = vmand %vm567_vm0, %vm577_vm1  ;;  %v2477_v55 = vld [vmem:[%s3274_s2] sm:$0x1]  ;;  %v2480_v63 = vsub.s32 0, %v638_v56  ;;  %vm573_vm0 = vcmp.ge.s32.totalorder %v563_v57, 0  ;;  %vm583_vm1 = vcmp.lt.s32.totalorder %v563_v57, 16 }
  0xc5   : > { %1729 = vmatprep.subr.bf16.mxu1 %v1882_v39  ;;  %vm586_vm5 = vmand %vm566_vm2, %vm576_vm3  ;;  %v1629_v54 = vsel %vm587_vm4, 1.0, %v2158_v53  ;;  %v914_v2 = vsub.s32 1, %v638_v56  ;;  %vm572_vm3 = vcmp.ge.s32.totalorder %v562_v59, 0  ;;  %vm582_vm4 = vcmp.lt.s32.totalorder %v562_v59, 16  ;;  %v747_v5 = vld [vmem:[#allocation7] sm:$0x7] }
  0xc6   : > { %1698 = vmatpush3.bf16.msra.mxu0 %v1876_v3  ;;  %v1628_v58 = vsel %vm586_vm5, 1.0, %v2158_v53  ;;  %vm589_vm10 = vmand %vm569_vm6, %vm579_vm7  ;;  %v618_v61 = vmul.f32 %v1629_v54, %v2477_v55  ;;  %vm575_vm6 = vcmp.ge.s32.totalorder %v565_v60, 0  ;;  %vm585_vm7 = vcmp.lt.s32.totalorder %v565_v60, 16  ;;  %v749_v25 = vld [vmem:[#allocation7 + $0x8] sm:$0x7]  ;;  %s2046_s12 = scalar_lea.vmem %s3207_s27, 2048 }
  0xc7   : > { %1699 = vmatprep.subr.bf16.mxu0 %v1877_v7  ;;  %v617_v0 = vmul.f32 %v1628_v58, %v2477_v55  ;;  %vm2483_vm15 = vmand %vm568_vm8, %vm578_vm9  ;;  %v1631_v3 = vsel %vm589_vm10, 1.0, %v2158_v53  ;;  %vm574_vm9 = vcmp.ge.s32.totalorder %v564_v62, 0  ;;  %vm584_vm10 = vcmp.lt.s32.totalorder %v564_v62, 16  ;;  %p2047_p1 = scmp.ne.s32.totalorder %s3207_s27, %s2046_s12  ;;  %p3452_p6 = scmp.ne.s32.totalorder %s3322_s15, 0 }
  0xc8   : > { %1730 = vmatpush3.bf16.msra.mxu1 %v1882_v39  ;;  %vm2487_vm2 = vmand %vm571_vm11, %vm581_vm12  ;;  %v644_v12 = vrot.slane %v618_v61, %v2480_v63  ;;  %v2505_v13 = vrot.slane %v747_v5, %v914_v2  ;;  %v1630_v19 = vsel %vm2483_vm15, 1.0, %v2158_v53  ;;  %v2540_v31 = vrot.slane %v749_v25, %v2480_v63  ;;  %s2159_s29 = smov [#allocation10]  }
  0xc9   : > { %1731 = vmatprep.subr.bf16.mxu1 %v1883_v40  ;;  %vm2491_vm5 = vmand %vm570_vm13, %vm580_vm14  ;;  %v640_v14 = vrot.slane %v617_v0, %v2480_v63  ;;  %vm770_vm13 = vcmask 1040384   ;;  %vm831_vm15 = vcmask 1046528   ;;  %p2048_p9 = pnand %p2047_p1, %p3452_p6  ;;  %s2050_s1 = sshll.u32 %s2159_s29, 4  ;;  %s2051_s1 = int_to_ptr.vmem [resolvable:$false] %s2050_s1 }
  0xca   : > { %1700 = vmatpush3.bf16.msra.mxu0 %v1877_v7  ;;  %v748_v7 = vld [vmem:[#allocation7 + $0x4] sm:$0x7]  ;;  %vm2495_vm8 = vmand %vm573_vm0, %vm583_vm1  ;;  %p2053_p13 = scmp.lt.s32.totalorder %s3207_s27, %s2051_s1 }
  0xcb   : > { %1701 = vmatprep.subr.bf16.mxu0 %v1878_v8  ;;  %vm2500_vm11 = vmand %vm572_vm3, %vm582_vm4  ;;  %v2516_v17 = vrot.slane %v748_v7, %v2480_v63  ;;  %v2518_v18 = vrot.slane %v748_v7, %v914_v2  ;;  %v1635_v23 = vsel %vm2495_vm8, 1.0, %v2158_v53  ;;  %p2049_p11 = pneg %p2048_p9 }
  0xcc   : > { %1732 = vmatpush3.bf16.msra.mxu1 %v1883_v40  ;;  %vm2508_vm12 = vmand %vm575_vm6, %vm585_vm7  ;;  %v624_v39 = vmul.f32 %v1635_v23, %v2477_v55 }
  0xcd   : > { %1733 = vmatprep.subr.bf16.mxu1 %v1884_v41  ;;  %vm594_vm14 = vmand %vm574_vm9, %vm584_vm10  ;;  %v1637_v29 = vsel %vm2508_vm12, 1.0, %v2158_v53 }
  0xce   : > { %1702 = vmatpush3.bf16.msra.mxu0 %v1878_v8  ;;  %v950_v8 = vsub.s32 2, %v638_v56  ;;  %v2562_v59 = vrot.slane %v624_v39, %v2480_v63 }
  0xcf   : > { %1703 = vmatprep.subr.bf16.mxu0 %v1879_v9 }
  0xd0   : > { %1734 = vmatpush3.bf16.msra.mxu1 %v1884_v41  ;;  %v2522_v20 = vrot.slane %v747_v5, %v950_v8  ;;  %v2530_v26 = vrot.slane %v748_v7, %v950_v8  ;;  %v2553_v50 = vrot.slane %v749_v25, %v950_v8 }
  0xd1   : > { %1735 = vmatprep.subr.bf16.mxu1 %v1885_v42 }
  0xd2   : > { %1704 = vmatpush3.bf16.msra.mxu0 %v1879_v9 }
  0xd3   : > { %1705 = vmatprep.subr.bf16.mxu0 %v1880_v10 }
  0xd4   : > { %1736 = vmatpush3.bf16.msra.mxu1 %v1885_v42 }
  0xd5   : > { %1737 = vmatprep.subr.bf16.mxu1 %v1886_v43 }
  0xd6   : > { %1706 = vmatpush3.bf16.msra.mxu0 %v1880_v10  ;;  %v620_v10 = vmul.f32 %v1631_v3, %v2477_v55 }
  0xd8   : > { %1738 = vmatpush3.bf16.msra.mxu1 %v1886_v43 }
  0xd9   : > { %1708 = vmatmul.mubr.bf16.vlgmr.msra.gmra.mrb[0].mxu0 %v369_v15  ;;  %1739 = vmatprep.subr.bf16.mxu1 %v1887_v44 }
  0xda   : > { %1711 = vmatprep.mubr.bf16.mxu0 %v370_v16  ;;  %v2513_v16 = vrot.slane %v747_v5, %v2480_v63 }
  0xdc   : > { %1740 = vmatpush3.bf16.msra.mxu1 %v1887_v44  ;;  %v626_v44 = vmul.f32 %v1637_v29, %v2477_v55 }
  0xdd   : > { %1741 = vmatprep.subr.bf16.mxu1 %v1888_v45 }
  0xde   : > { %v2568_v60 = vrot.slane %v626_v44, %v2480_v63 }
  0xe0   : > { %1742 = vmatpush3.bf16.msra.mxu1 %v1888_v45  ;;  %v2548_v45 = vrot.slane %v749_v25, %v914_v2 }
  0xe1   : > { %1712 = vmatmul.mubr.bf16.gmra.mrb[4].mxu0 %v371_v21  ;;  %v1633_v21 = vsel %vm2487_vm2, 1.0, %v2158_v53 }
  0xe2   : > { %1715 = vmatprep.mubr.bf16.mxu0 %v372_v22  ;;  %v1632_v22 = vsel %vm2491_vm5, 1.0, %v2158_v53 }
  0xe3   : > { %v621_v38 = vmul.f32 %v1632_v22, %v2477_v55 }
  0xe5   : > { %v2558_v57 = vrot.slane %v621_v38, %v2480_v63 }
  0xe9   : > { %1716 = vmatmul.mubr.bf16.gmra.mrb[8].mxu0 %v373_v27  ;;  %v2533_v27 = vrot.slane %v620_v10, %v2480_v63 }
  0xea   : > { %1719 = vmatprep.mubr.bf16.mxu0 %v374_v28  ;;  %v1634_v28 = vsel %vm2500_vm11, 1.0, %v2158_v53 }
  0xeb   : > { %v623_v43 = vmul.f32 %v1634_v28, %v2477_v55 }
  0xf1   : > { %1720 = vmatmul.mubr.bf16.gmra.mrb[12].mxu0 %v375_v33  ;;  %v619_v33 = vmul.f32 %v1630_v19, %v2477_v55 }
  0xf2   : > { %1723 = vmatprep.mubr.bf16.mxu0 %v376_v34  ;;  %v1636_v34 = vsel %vm594_vm14, 1.0, %v2158_v53 }
  0xf3   : > { %v625_v48 = vmul.f32 %v1636_v34, %v2477_v55  ;;  %v648_v52 = vrot.slane %v619_v33, %v2480_v63 }
  0xf5   : > { %v2574_v2 = vrot.slane %v625_v48, %v2480_v63 }
  0xf9   : > { %1724 = vmatmul.mubr.bf16.gmra.mrb[16].mxu0 %v377_v37  ;;  %v622_v37 = vmul.f32 %v1633_v21, %v2477_v55  ;;  %v2565_v55 = vrot.slane %v623_v43, %v2480_v63 }
  0xfb   : > { %v660_v56 = vrot.slane %v622_v37, %v2480_v63 }
 0x1ac   : > { %v1709_v24 = vpop.f32.mrb[0].mxu0 }
 0x1ad   : > { %v689_v30 = vadd.f32 %v1709_v24, %v644_v12  ;;  %v476_v32 = vpop.f32.mrb[1].mxu0 }
 0x1ae   : > { %v687_v35 = vadd.f32 %v640_v14, %v476_v32  ;;  %v1710_v36 = vpop.f32.mrb[2].mxu0 }
 0x1af   : > { %v709_v40 = vmax.f32 %v689_v30, 0.0  ;;  %v690_v41 = vadd.f32 %v1710_v36, %v644_v12  ;;  %v479_v42 = vpop.f32.mrb[3].mxu0 }
 0x1b0   : > { %v707_v46 = vmax.f32 %v687_v35, 0.0  ;;  %v688_v47 = vadd.f32 %v640_v14, %v479_v42 }
 0x1b1   : > { %v2551_v49 = vmin.f32 %v709_v40, 6.0  ;;  %v710_v51 = vmax.f32 %v690_v41, 0.0 }
 0x1b2   : > { %v727_v53 = vmin.f32 %v707_v46, 6.0  ;;  %v708_v54 = vmax.f32 %v688_v47, 0.0 }
 0x1b3   : > { %v774_v58 = vrot.slane %v2551_v49, 7  ;;  %v2571_v0 = vmin.f32 %v710_v51, 6.0  ;;  %v918_v4 = vmul.f32 %v2505_v13, %v2551_v49  ;;  %v2581_v5 = vmul.f32 %v2518_v18, %v2551_v49 }
 0x1b4   : > { %v771_v62 = vrot.slane %v727_v53, 7  ;;  %v1713_v1 = vpop.f32.mrb[4].mxu0  ;;  %v728_v6 = vmin.f32 %v708_v54, 6.0  ;;  %v832_v9 = vrot.slane %v727_v53, 1  ;;  %v916_v10 = vmul.f32 %v2505_v13, %v727_v53 }
 0x1b5   : > { %v822_v3 = vsel %vm770_vm13, 0.0, %v774_v58  ;;  %v492_v7 = vpop.f32.mrb[5].mxu0  ;;  %v775_v11 = vrot.slane %v2571_v0, 7  ;;  %v3294_v15 = vrot.slane %v2571_v0, 1  ;;  %v693_v19 = vadd.f32 %v1713_v1, %v2533_v27 }
 0x1b6   : > { %v821_v8 = vsel %vm770_vm13, 0.0, %v771_v62  ;;  %v1714_v63 = vpop.f32.mrb[6].mxu0  ;;  %v898_v12 = vmul.f32 %v2513_v16, %v822_v3  ;;  %v2591_v22 = vmul.f32 %v2516_v17, %v822_v3  ;;  %v772_v24 = vrot.slane %v728_v6, 7 }
 0x1b7   : > { %v896_v14 = vmul.f32 %v2513_v16, %v821_v8  ;;  %v495_v21 = vpop.f32.mrb[7].mxu0  ;;  %v776_v23 = vsel %vm770_vm13, %v774_v58, %v775_v11  ;;  %v833_v25 = vrot.slane %v728_v6, 1  ;;  %v883_v29 = vsel %vm831_vm15, %v3294_v15, 0.0 }
 0x1b8   : > { %v899_v30 = vmul.f32 %v2513_v16, %v776_v23  ;;  %v919_v32 = vmul.f32 %v2505_v13, %v2571_v0  ;;  %v955_v33 = vmul.f32 %v2522_v20, %v883_v29  ;;  %v773_v34 = vsel %vm770_vm13, %v771_v62, %v772_v24 }
 0x1b9   : > { %v932_v28 = vadd.f32 %v916_v10, %v896_v14  ;;  %v834_v35 = vsel %vm831_vm15, %v832_v9, %v833_v25  ;;  %v917_v36 = vmul.f32 %v2505_v13, %v728_v6  ;;  %v882_v38 = vsel %vm831_vm15, %v833_v25, 0.0 }
 0x1ba   : > { %v935_v37 = vadd.f32 %v919_v32, %v899_v30  ;;  %v897_v39 = vmul.f32 %v2513_v16, %v773_v34  ;;  %v952_v40 = vmul.f32 %v2522_v20, %v834_v35  ;;  %v953_v41 = vmul.f32 %v2522_v20, %v882_v38 }
 0x1bb   : > { %v989_v42 = vmul.f32 %v2516_v17, %v776_v23  ;;  %v713_v43 = vmax.f32 %v693_v19, 0.0  ;;  %v691_v44 = vadd.f32 %v648_v52, %v492_v7  ;;  %v694_v53 = vadd.f32 %v1714_v63, %v2533_v27 }
 0x1bc   : > { %v1717_v46 = vpop.f32.mrb[8].mxu0  ;;  %v2609_v47 = vadd.f32 %v955_v33, %v935_v37  ;;  %v933_v48 = vadd.f32 %v917_v36, %v897_v39  ;;  %v2611_v51 = vadd.f32 %v952_v40, %v932_v28  ;;  %v692_v1 = vadd.f32 %v648_v52, %v495_v21 }
 0x1bd   : > { %v508_v54 = vpop.f32.mrb[9].mxu0  ;;  %v2614_v58 = vmin.f32 %v713_v43, 6.0  ;;  %v711_v62 = vmax.f32 %v691_v44, 0.0  ;;  %v697_v3 = vadd.f32 %v1717_v46, %v660_v56  ;;  %v714_v9 = vmax.f32 %v694_v53, 0.0 }
 0x1be   : > { %v1718_v6 = vpop.f32.mrb[10].mxu0  ;;  %v969_v8 = vadd.f32 %v953_v41, %v933_v48  ;;  %v695_v10 = vadd.f32 %v2558_v57, %v508_v54  ;;  %v2617_v14 = vadd.f32 %v918_v4, %v898_v12  ;;  %v2621_v19 = vmul.f32 %v2518_v18, %v2571_v0 }
 0x1bf   : > { %v698_v7 = vadd.f32 %v1718_v6, %v660_v56  ;;  %v511_v11 = vpop.f32.mrb[11].mxu0  ;;  %v2624_v27 = vmul.f32 %v2530_v26, %v883_v29  ;;  %v780_v63 = vrot.slane %v2614_v58, 7  ;;  %v2629_v21 = vmin.f32 %v711_v62, 6.0 }
 0x1c0   : > { %v2627_v52 = vadd.f32 %v989_v42, %v969_v8  ;;  %v2631_v23 = vmin.f32 %v714_v9, 6.0  ;;  %v712_v24 = vmax.f32 %v692_v1, 0.0  ;;  %v717_v4 = vmax.f32 %v697_v3, 0.0 }
 0x1c1   : > { %v2634_v56 = vsel %vm770_vm13, 0.0, %v780_v63  ;;  %v715_v12 = vmax.f32 %v695_v10, 0.0  ;;  %v718_v25 = vmax.f32 %v698_v7, 0.0  ;;  %v922_v30 = vmul.f32 %v2505_v13, %v2614_v58 }
 0x1c2   : > { %v902_v29 = vmul.f32 %v2513_v16, %v2634_v56  ;;  %v2643_v32 = vmul.f32 %v2518_v18, %v2614_v58  ;;  %v2648_v34 = vmul.f32 %v2505_v13, %v2629_v21  ;;  %v2652_v35 = vmul.f32 %v2518_v18, %v2629_v21 }
 0x1c3   : > { %v781_v36 = vrot.slane %v2631_v23, 7  ;;  %v2656_v39 = vmin.f32 %v712_v24, 6.0  ;;  %v2658_v40 = vmin.f32 %v717_v4, 6.0  ;;  %v2660_v41 = vmin.f32 %v715_v12, 6.0 }
 0x1c4   : > { %v1721_v37 = vpop.f32.mrb[12].mxu0  ;;  %v923_v44 = vmul.f32 %v2505_v13, %v2631_v23  ;;  %v2669_v46 = vmul.f32 %v2518_v18, %v2631_v23  ;;  %v2671_v48 = vmin.f32 %v718_v25, 6.0  ;;  %v2673_v54 = vadd.f32 %v922_v30, %v902_v29 }
 0x1c5   : > { %3350 = vst [vmem:[#allocation29_spill] sm:$0xff] %v2658_v40  ;;  %v524_v42 = vpop.f32.mrb[13].mxu0  ;;  %v2663_v43 = vsel %vm770_vm13, %v780_v63, %v781_v36  ;;  %v696_v1 = vadd.f32 %v2558_v57, %v511_v11  ;;  %v701_v3 = vadd.f32 %v1721_v37, %v2562_v59  ;;  %v2682_v9 = vmul.f32 %v2505_v13, %v2656_v39 }
 0x1c6   : > { %3351 = vst [vmem:[#allocation30_spill] sm:$0xff] %v2669_v46  ;;  %3352 = vst [vmem:[#allocation31_spill] sm:$0xff] %v2671_v48  ;;  %v1722_v53 = vpop.f32.mrb[14].mxu0  ;;  %v903_v62 = vmul.f32 %v2513_v16, %v2663_v43  ;;  %v2686_v10 = vmul.f32 %v2518_v18, %v2656_v39  ;;  %v786_v7 = vrot.slane %v2658_v40, 7  ;;  %v926_v57 = vmul.f32 %v2505_v13, %v2658_v40 }
 0x1c7   : > { %v527_v6 = vpop.f32.mrb[15].mxu0  ;;  %v783_v11 = vrot.slane %v2660_v41, 7  ;;  %v2700_v12 = vmul.f32 %v2518_v18, %v2658_v40  ;;  %v787_v29 = vrot.slane %v2671_v48, 7  ;;  %v924_v37 = vmul.f32 %v2505_v13, %v2660_v41 }
 0x1c8   : > { %v2689_v63 = vadd.f32 %v923_v44, %v903_v62  ;;  %v2696_v4 = vsel %vm770_vm13, 0.0, %v786_v7  ;;  %v2713_v44 = vmul.f32 %v2518_v18, %v2660_v41  ;;  %v927_v33 = vmul.f32 %v2505_v13, %v2671_v48 }
 0x1c9   : > { %3353 = vst [vmem:[#allocation32_spill] sm:$0xff] %v2696_v4  ;;  %3354 = vst [vmem:[#allocation33_spill] sm:$0xff] %v2700_v12  ;;  %v906_v30 = vmul.f32 %v2513_v16, %v2696_v4  ;;  %v2707_v36 = vsel %vm770_vm13, 0.0, %v783_v11  ;;  %v2717_v62 = vmul.f32 %v2516_v17, %v2696_v4  ;;  %v2722_v25 = vsel %vm770_vm13, %v786_v7, %v787_v29 }
 0x1ca   : > { %3355 = vst [vmem:[#allocation34_spill] sm:$0xff] %v2707_v36  ;;  %3356 = vst [vmem:[#allocation35_spill] sm:$0xff] %v2713_v44  ;;  %v904_v24 = vmul.f32 %v2513_v16, %v2707_v36  ;;  %v2727_v61 = vmul.f32 %v2516_v17, %v2707_v36  ;;  %v907_v15 = vmul.f32 %v2513_v16, %v2722_v25  ;;  %v716_v8 = vmax.f32 %v696_v1, 0.0 }
 0x1cb   : > { %3357 = vst [vmem:[#allocation36_spill] sm:$0xff] %v2717_v62  ;;  %3358 = vst [vmem:[#allocation37_spill] sm:$0xff] %v2722_v25  ;;  %v2735_v62 = vmul.f32 %v2518_v18, %v2671_v48  ;;  %v721_v7 = vmax.f32 %v701_v3, 0.0  ;;  %v699_v29 = vadd.f32 %v2565_v55, %v524_v42  ;;  %v702_v28 = vadd.f32 %v1722_v53, %v2562_v59 }
 0x1cc   : > { %v1725_v38 = vpop.f32.mrb[16].mxu0  ;;  %3359 = vst [vmem:[#allocation38_spill] sm:$0xff] %v2727_v61  ;;  %v2739_v44 = vadd.f32 %v926_v57, %v906_v30  ;;  %v2741_v61 = vadd.f32 %v927_v33, %v907_v15  ;;  %v2745_v40 = vmul.f32 %v2516_v17, %v2722_v25  ;;  %v2747_v1 = vmin.f32 %v716_v8, 6.0 }
 0x1cd   : > { %v540_v12 = vpop.f32.mrb[17].mxu0  ;;  %3360 = vst [vmem:[#allocation39_spill] sm:$0xff] %v2735_v62  ;;  %v2749_v46 = vadd.f32 %v924_v37, %v904_v24  ;;  %v2751_v62 = vmin.f32 %v721_v7, 6.0  ;;  %v719_v3 = vmax.f32 %v699_v29, 0.0  ;;  %v722_v42 = vmax.f32 %v702_v28, 0.0 }
 0x1ce   : > { %v1726_v4 = vpop.f32.mrb[18].mxu0  ;;  %3361 = vst [vmem:[#allocation40_spill] sm:$0xff] %v2739_v44  ;;  %3362 = vst [vmem:[#allocation41_spill] sm:$0xff] %v2741_v61  ;;  %v784_v59 = vrot.slane %v2747_v1, 7  ;;  %v700_v53 = vadd.f32 %v2565_v55, %v527_v6  ;;  %v705_v15 = vadd.f32 %v1725_v38, %v2568_v60  ;;  %v703_v33 = vadd.f32 %v2574_v2, %v540_v12 }
 0x1cf   : > { %3363 = vst [vmem:[#allocation42_spill] sm:$0xff] %v2745_v40  ;;  %v543_v36 = vpop.f32.mrb[19].mxu0  ;;  %3364 = vst [vmem:[#allocation43_spill] sm:$0xff] %v2751_v62  ;;  %v925_v8 = vmul.f32 %v2505_v13, %v2747_v1  ;;  %v2762_v24 = vmul.f32 %v2518_v18, %v2747_v1  ;;  %v792_v30 = vrot.slane %v2751_v62, 7  ;;  %v853_v55 = vrot.slane %v2751_v62, 1 }
 0x1d0   : > { %v2766_v28 = vsel %vm770_vm13, %v783_v11, %v784_v59  ;;  %v2769_v6 = vmin.f32 %v719_v3, 6.0  ;;  %v2771_v38 = vmin.f32 %v722_v42, 6.0  ;;  %v930_v7 = vmul.f32 %v2505_v13, %v2751_v62 }
 0x1d1   : > { %3365 = vst [vmem:[#allocation44_spill] sm:$0xff] %v2762_v24  ;;  %v905_v12 = vmul.f32 %v2513_v16, %v2766_v28  ;;  %v2776_v37 = vsel %vm770_vm13, 0.0, %v792_v30  ;;  %v2782_v29 = vmul.f32 %v2518_v18, %v2751_v62  ;;  %v2786_v11 = vmul.f32 %v2516_v17, %v2766_v28 }
 0x1d2   : > { %3366 = vst [vmem:[#allocation45_spill] sm:$0xff] %v2769_v6  ;;  %3367 = vst [vmem:[#allocation46_spill] sm:$0xff] %v2771_v38  ;;  %v910_v3 = vmul.f32 %v2513_v16, %v2776_v37  ;;  %v789_v42 = vrot.slane %v2769_v6, 7  ;;  %v720_v59 = vmax.f32 %v700_v53, 0.0  ;;  %v2795_v40 = vmul.f32 %v2516_v17, %v2776_v37 }
 0x1d3   : > { %3368 = vst [vmem:[#allocation47_spill] sm:$0xff] %v2776_v37  ;;  %3369 = vst [vmem:[#allocation48_spill] sm:$0xff] %v2782_v29  ;;  %v2791_v57 = vadd.f32 %v925_v8, %v905_v12  ;;  %v793_v25 = vrot.slane %v2771_v38, 7  ;;  %v725_v62 = vmax.f32 %v705_v15, 0.0  ;;  %v928_v61 = vmul.f32 %v2505_v13, %v2769_v6 }
 0x1d4   : > { %3370 = vst [vmem:[#allocation49_spill] sm:$0xff] %v2786_v11  ;;  %3371 = vst [vmem:[#allocation50_spill] sm:$0xff] %v2795_v40  ;;  %v2799_v29 = vsel %vm770_vm13, 0.0, %v789_v42  ;;  %v854_v44 = vrot.slane %v2771_v38, 1  ;;  %v946_v53 = vadd.f32 %v930_v7, %v910_v3  ;;  %v2809_v12 = vmul.f32 %v2518_v18, %v2769_v6 }
 0x1d5   : > { %3372 = vst [vmem:[#allocation51_spill] sm:$0xff] %v2799_v29  ;;  %v908_v8 = vmul.f32 %v2513_v16, %v2799_v29  ;;  %v2812_v15 = vsel %vm770_vm13, %v792_v30, %v793_v25  ;;  %v2816_v40 = vmul.f32 %v2516_v17, %v2799_v29  ;;  %v931_v3 = vmul.f32 %v2505_v13, %v2771_v38 }
 0x1d6   : > { %3373 = vst [vmem:[#allocation52_spill] sm:$0xff] %v2809_v12  ;;  %3374 = vst [vmem:[#allocation53_spill] sm:$0xff] %v2812_v15  ;;  %v2819_v24 = vsel %vm831_vm15, %v853_v55, %v854_v44  ;;  %v911_v7 = vmul.f32 %v2513_v16, %v2812_v15  ;;  %v2827_v37 = vmul.f32 %v2518_v18, %v2771_v38  ;;  %v2829_v12 = vmin.f32 %v720_v59, 6.0 }
 0x1d7   : > { %3375 = vst [vmem:[#allocation54_spill] sm:$0xff] %v2816_v40  ;;  %3376 = vst [vmem:[#allocation55_spill] sm:$0xff] %v2819_v24  ;;  %v745_v25 = vmin.f32 %v725_v62, 6.0  ;;  %v723_v30 = vmax.f32 %v703_v33, 0.0  ;;  %v966_v40 = vmul.f32 %v2522_v20, %v2819_v24  ;;  %v706_v55 = vadd.f32 %v1726_v4, %v2568_v60 }
 0x1d8   : > { %3377 = vst [vmem:[#allocation56_spill] sm:$0xff] %v2827_v37  ;;  %v947_v6 = vadd.f32 %v931_v3, %v911_v7  ;;  %v704_v29 = vadd.f32 %v2574_v2, %v543_v36  ;;  %v2835_v11 = vadd.f32 %v928_v61, %v908_v8  ;;  %v2838_v48 = vsel %vm831_vm15, %v854_v44, 0.0 }
 0x1d9   : > { %3378 = vst [vmem:[#allocation57_spill] sm:$0xff] %v2838_v48  ;;  %v2842_v37 = vmul.f32 %v2516_v17, %v2812_v15  ;;  %v790_v62 = vrot.slane %v2829_v12, 7  ;;  %v929_v59 = vmul.f32 %v2505_v13, %v2829_v12  ;;  %v798_v7 = vrot.slane %v745_v25, 7 }
 0x1da   : > { %v2848_v60 = vmin.f32 %v723_v30, 6.0  ;;  %v982_v2 = vadd.f32 %v966_v40, %v946_v53  ;;  %v726_v4 = vmax.f32 %v706_v55, 0.0  ;;  %v724_v36 = vmax.f32 %v704_v29, 0.0 }
 0x1db   : > { %3379 = vst [vmem:[#allocation58_spill] sm:$0xff] %v2842_v37  ;;  %v2851_v61 = vsel %vm770_vm13, %v789_v42, %v790_v62  ;;  %v2857_v8 = vmul.f32 %v2518_v18, %v2829_v12  ;;  %v830_v3 = vsel %vm770_vm13, 0.0, %v798_v7  ;;  %v859_v42 = vrot.slane %v745_v25, 1 }
 0x1dc   : > { %v909_v44 = vmul.f32 %v2513_v16, %v2851_v61  ;;  %v795_v13 = vrot.slane %v2848_v60, 7  ;;  %v2863_v30 = vmul.f32 %v2516_v17, %v2851_v61  ;;  %v2866_v40 = vmul.f32 %v2540_v31, %v830_v3 }
 0x1dd   : > { %3380 = vst [vmem:[#allocation59_spill] sm:$0xff] %v2857_v8  ;;  %v2869_v29 = vmul.f32 %v2548_v45, %v745_v25  ;;  %v746_v62 = vmin.f32 %v726_v4, 6.0  ;;  %v2874_v33 = vmin.f32 %v724_v36, 6.0  ;;  %v967_v38 = vmul.f32 %v2522_v20, %v2838_v48 }
 0x1de   : > { %3381 = vst [vmem:[#allocation60_spill] sm:$0xff] %v2863_v30  ;;  %3382 = vst [vmem:[#allocation61_spill] sm:$0xff] %v2866_v40  ;;  %v2871_v53 = vadd.f32 %v929_v59, %v909_v44  ;;  %v829_v55 = vsel %vm770_vm13, 0.0, %v795_v13  ;;  %v3384_v3 = vrot.slane %v2656_v39, 7  ;;  %v3385_v40 = vrot.slane %v2629_v21, 7 }
 0x1df   : > { %3383 = vst [vmem:[#allocation62_spill] sm:$0xff] %v2869_v29  ;;  %v1002_v24 = vmul.f32 %v2516_v17, %v829_v55  ;;  %v1038_v59 = vmul.f32 %v2518_v18, %v2848_v60  ;;  %v799_v44 = vrot.slane %v746_v62, 7  ;;  %v860_v4 = vrot.slane %v746_v62, 1 }
 0x1e0   : > { %v779_v25 = vsel %vm770_vm13, %v3385_v40, %v3384_v3  ;;  %v796_v36 = vrot.slane %v2874_v33, 7  ;;  %v2890_v37 = vmul.f32 %v2548_v45, %v2848_v60  ;;  %v3313_v48 = vrot.slane %v2874_v33, 1 }
 0x1e1   : > { %v1018_v29 = vadd.f32 %v1002_v24, %v982_v2  ;;  %v983_v8 = vadd.f32 %v967_v38, %v947_v6  ;;  %v2894_v15 = vmul.f32 %v2540_v31, %v829_v55  ;;  %v2897_v40 = vsel %vm770_vm13, %v798_v7, %v799_v44 }
 0x1e2   : > { %3386 = vst [vmem:[#allocation63_spill] sm:$0xff] %v2890_v37  ;;  %v2900_v3 = vsel %vm831_vm15, %v859_v42, %v860_v4  ;;  %v2903_v30 = vsel %vm770_vm13, %v795_v13, %v796_v36  ;;  %v2908_v2 = vmul.f32 %v2548_v45, %v746_v62  ;;  %v2913_v6 = vsel %vm831_vm15, %v3313_v48, 0.0 }
 0x1e3   : > { %3387 = vst [vmem:[#allocation64_spill] sm:$0xff] %v2894_v15  ;;  %3388 = vst [vmem:[#allocation65_spill] sm:$0xff] %v2900_v3  ;;  %v2905_v24 = vadd.f32 %v1038_v59, %v1018_v29  ;;  %v1039_v38 = vmul.f32 %v2518_v18, %v2874_v33  ;;  %v2918_v7 = vsel %vm831_vm15, %v860_v4, 0.0  ;;  %v1003_v13 = vmul.f32 %v2516_v17, %v2903_v30 }
 0x1e4   : > { %3390 = vst [vmem:[#allocation67_spill] sm:$0xff] %v2908_v2  ;;  %3391 = vst [vmem:[#allocation68_spill] sm:$0xff] %v2913_v6  ;;  %v1075_v42 = vmul.f32 %v2530_v26, %v2913_v6  ;;  %v3393_v29 = vrot.slane %v2629_v21, 7  ;;  %v3394_v62 = vrot.slane %v2571_v0, 1  ;;  %v3395_v59 = vrot.slane %v2551_v49, 1 }
 0x1e5   : > { %3389 = vst [vmem:[#allocation66_spill] sm:$0xff] %v2905_v24  ;;  %3392 = vst [vmem:[#allocation69_spill] sm:$0xff] %v2918_v7  ;;  %v838_v18 = vrot.slane %v2629_v21, 1  ;;  %v839_v4 = vrot.slane %v2656_v39, 1  ;;  %v1019_v48 = vadd.f32 %v1003_v13, %v983_v8  ;;  %v901_v3 = vmul.f32 %v2513_v16, %v779_v25 }
 0x1e6   : > { %v823_v55 = vsel %vm770_vm13, 0.0, %v3393_v29  ;;  %v837_v44 = vsel %vm831_vm15, %v3395_v59, %v3394_v62  ;;  %v991_v62 = vmul.f32 %v2516_v17, %v779_v25  ;;  %v992_v13 = vmul.f32 %v2516_v17, %v2634_v56 }
 0x1e7   : > { %v900_v36 = vmul.f32 %v2513_v16, %v823_v55  ;;  %v954_v2 = vmul.f32 %v2522_v20, %v837_v44  ;;  %v990_v7 = vmul.f32 %v2516_v17, %v823_v55  ;;  %v840_v29 = vsel %vm831_vm15, %v838_v18, %v839_v4 }
 0x1e8   : > { %v884_v0 = vsel %vm831_vm15, %v839_v4, 0.0  ;;  %v1055_v59 = vadd.f32 %v1039_v38, %v1019_v48  ;;  %v937_v6 = vadd.f32 %v2682_v9, %v901_v3  ;;  %v956_v37 = vmul.f32 %v2522_v20, %v840_v29 }
 0x1e9   : > { %v936_v49 = vadd.f32 %v2648_v34, %v900_v36  ;;  %v957_v8 = vmul.f32 %v2522_v20, %v884_v0  ;;  %v970_v16 = vadd.f32 %v954_v2, %v2617_v14  ;;  %v993_v18 = vmul.f32 %v2516_v17, %v2663_v43 }
 0x1ea   : > { %v1004_v34 = vadd.f32 %v2591_v22, %v2611_v51  ;;  %v2952_v4 = vadd.f32 %v1075_v42, %v1055_v59  ;;  %v1007_v9 = vadd.f32 %v991_v62, %v2609_v47  ;;  %v1041_v14 = vadd.f32 %v2621_v19, %v2627_v52 }
 0x1eb   : > { %v972_v48 = vadd.f32 %v956_v37, %v936_v49  ;;  %v973_v38 = vadd.f32 %v957_v8, %v937_v6  ;;  %v1006_v3 = vadd.f32 %v990_v7, %v970_v16  ;;  %v1060_v2 = vmul.f32 %v2530_v26, %v837_v44 }
 0x1ec   : > { %v1040_v36 = vadd.f32 %v2581_v5, %v1004_v34  ;;  %v1043_v17 = vadd.f32 %v2686_v10, %v1007_v9  ;;  %v1062_v22 = vmul.f32 %v2530_v26, %v840_v29  ;;  %v1063_v37 = vmul.f32 %v2530_v26, %v884_v0 }
 0x1ed   : > { %v1008_v24 = vadd.f32 %v992_v13, %v972_v48  ;;  %v1009_v15 = vadd.f32 %v993_v18, %v973_v38  ;;  %v1042_v51 = vadd.f32 %v2652_v35, %v1006_v3  ;;  %v1077_v47 = vadd.f32 %v2624_v27, %v1041_v14  ;;  %v2991_v48 = vld [vmem:[%s3276_s4] ss:$0 sm:$0xff] }
 0x1ee   : > { %v1076_v6 = vadd.f32 %v1060_v2, %v1040_v36  ;;  %v1096_v5 = vmul.f32 %v2540_v31, %v823_v55  ;;  %v1097_v7 = vmul.f32 %v2540_v31, %v779_v25  ;;  %v1132_v19 = vmul.f32 %v2548_v45, %v2629_v21 }
 0x1ef   : > { %v1133_v52 = vmul.f32 %v2548_v45, %v2656_v39  ;;  %v1078_v10 = vadd.f32 %v1062_v22, %v1042_v51  ;;  %v1079_v42 = vadd.f32 %v1063_v37, %v1043_v17  ;;  %v1168_v44 = vmul.f32 %v2553_v50, %v840_v29 }
 0x1f0   : > { %v1169_v35 = vmul.f32 %v2553_v50, %v884_v0  ;;  %v1112_v49 = vadd.f32 %v1096_v5, %v1076_v6  ;;  %v1113_v62 = vadd.f32 %v1097_v7, %v1077_v47  ;;  %v3396_v27 = vrot.slane %v2631_v23, 1 }
 0x1f1   : > { %v3397_v55 = vrot.slane %v2614_v58, 1  ;;  %v1098_v18 = vmul.f32 %v2540_v31, %v2634_v56  ;;  %v1099_v34 = vmul.f32 %v2540_v31, %v2663_v43  ;;  %v1134_v3 = vmul.f32 %v2548_v45, %v2614_v58 }
 0x1f2   : > { %v3398_v59 = vmov %v3396_v27  ;;  %v1148_v16 = vadd.f32 %v1132_v19, %v1112_v49  ;;  %v1149_v13 = vadd.f32 %v1133_v52, %v1113_v62  ;;  %v1135_v36 = vmul.f32 %v2548_v45, %v2631_v23 }
 0x1f3   : > { %v843_v25 = vsel %vm831_vm15, %v3397_v55, %v3396_v27  ;;  %v885_v21 = vsel %vm831_vm15, %v3398_v59, 0.0  ;;  %v1114_v2 = vadd.f32 %v1098_v18, %v1078_v10  ;;  %v1115_v17 = vadd.f32 %v1099_v34, %v1079_v42  ;;  %v3402_v10 = vld [vmem:[#allocation30_spill] sm:$0xff] }
 0x1f4   : > { %v958_v39 = vmul.f32 %v2522_v20, %v843_v25  ;;  %v959_v8 = vmul.f32 %v2522_v20, %v885_v21  ;;  %v1064_v29 = vmul.f32 %v2530_v26, %v843_v25  ;;  %v1065_v0 = vmul.f32 %v2530_v26, %v885_v21 }
 0x1f5   : > { %v1184_v14 = vadd.f32 %v1168_v44, %v1148_v16  ;;  %v1185_v56 = vadd.f32 %v1169_v35, %v1149_v13  ;;  %v1170_v43 = vmul.f32 %v2553_v50, %v843_v25  ;;  %v1171_v22 = vmul.f32 %v2553_v50, %v885_v21  ;;  %v3403_v16 = vld [vmem:[#allocation34_spill] sm:$0xff] }
 0x1f6   : > { %v974_v38 = vadd.f32 %v958_v39, %v2673_v54  ;;  %v975_v9 = vadd.f32 %v959_v8, %v2689_v63  ;;  %v3399_v51 = vrot.slane %v2747_v1, 1  ;;  %v3400_v54 = vrot.slane %v2660_v41, 1 }
 0x1f7   : > { %v1207_v23 = vadd.f32 %v2991_v48, %v1184_v14  ;;  %v1208_v6 = vadd.f32 %v2991_v48, %v1185_v56  ;;  %v1150_v47 = vadd.f32 %v1134_v3, %v1114_v2  ;;  %v1151_v5 = vadd.f32 %v1135_v36, %v1115_v17 }
 0x1f8   : > { %v846_v63 = vsel %vm831_vm15, %v3400_v54, %v3399_v51  ;;  %v3401_v37 = vmov %v3399_v51  ;;  %v1044_v52 = vadd.f32 %v2643_v32, %v1008_v24  ;;  %v1045_v42 = vadd.f32 %v3402_v10, %v1009_v15 }
 0x1f9   : > { %v886_v58 = vsel %vm831_vm15, %v3401_v37, 0.0  ;;  %v960_v7 = vmul.f32 %v2522_v20, %v846_v63  ;;  %v1223_v44 = vmax.f32 %v1207_v23, 0.0  ;;  %v1224_v35 = vmax.f32 %v1208_v6, 0.0 }
 0x1fa   : > { %v961_v19 = vmul.f32 %v2522_v20, %v886_v58  ;;  %v1186_v49 = vadd.f32 %v1170_v43, %v1150_v47  ;;  %v1187_v62 = vadd.f32 %v1171_v22, %v1151_v5  ;;  %v1066_v25 = vmul.f32 %v2530_v26, %v846_v63  ;;  %v3404_v43 = vld [vmem:[#allocation31_spill] sm:$0xff]  ;;  %v3406_v22 = vld [vmem:[#allocation29_spill] sm:$0xff]  ;;  %v3409_v5 = vld [vmem:[#allocation38_spill] sm:$0xff] }
 0x1fb   : > { %v3016_v27 = vadd.f32 %v960_v7, %v2749_v46  ;;  %v1067_v59 = vmul.f32 %v2530_v26, %v886_v58  ;;  %v1239_v21 = vmin.f32 %v1223_v44, 6.0  ;;  %v1240_v39 = vmin.f32 %v1224_v35, 6.0 }
 0x1fc   : > { %v3019_v55 = vadd.f32 %v961_v19, %v2791_v57  ;;  %v1209_v32 = vadd.f32 %v2991_v48, %v1186_v49  ;;  %v1210_v15 = vadd.f32 %v2991_v48, %v1187_v62  ;;  %v1080_v24 = vadd.f32 %v1064_v29, %v1044_v52  ;;  %v3412_v49 = vld [vmem:[#allocation41_spill] sm:$0xff] }
 0x1fd   : > { %v1081_v8 = vadd.f32 %v1065_v0, %v1045_v42  ;;  %v1100_v13 = vmul.f32 %v2540_v31, %v3403_v16  ;;  %v1101_v46 = vmul.f32 %v2540_v31, %v2766_v28  ;;  %v1255_v57 = vpack.c.bf16 %v1240_v39, %v1239_v21  ;;  %v3411_v42 = vld [vmem:[#allocation40_spill] sm:$0xff]  ;;  %v3413_v21 = vld [vmem:[#allocation35_spill] sm:$0xff] }
 0x1fe   : > { %v1225_v18 = vmax.f32 %v1209_v32, 0.0  ;;  %v1226_v34 = vmax.f32 %v1210_v15, 0.0  ;;  %v1136_v3 = vmul.f32 %v2548_v45, %v2660_v41  ;;  %v1137_v56 = vmul.f32 %v2548_v45, %v2747_v1  ;;  %v3414_v32 = vld [vmem:[#allocation44_spill] sm:$0xff] }
 0x1ff   : > { %v1116_v36 = vadd.f32 %v1100_v13, %v1080_v24  ;;  %v1117_v14 = vadd.f32 %v1101_v46, %v1081_v8  ;;  %v1172_v29 = vmul.f32 %v2553_v50, %v846_v63  ;;  %1743 = vmatprep.mubr.bf16.mxu1 %v1255_v57  ;;  %v1173_v17 = vmul.f32 %v2553_v50, %v886_v58  ;;  %v3410_v58 = vld [vmem:[#allocation49_spill] sm:$0xff] }
 0x200   : > { %v1241_v0 = vmin.f32 %v1225_v18, 6.0  ;;  %v1242_v2 = vmin.f32 %v1226_v34, 6.0  ;;  %v3405_v28 = vrot.slane %v3404_v43, 1  ;;  %v3407_v51 = vrot.slane %v3406_v22, 1  ;;  %v3416_v13 = vld [vmem:[#allocation37_spill] sm:$0xff] }
 0x201   : > { %v1152_v37 = vadd.f32 %v1136_v3, %v1116_v36  ;;  %v1153_v41 = vadd.f32 %v1137_v56, %v1117_v14  ;;  %v1010_v7 = vadd.f32 %v3409_v5, %v974_v38  ;;  %v1011_v19 = vadd.f32 %v3410_v58, %v975_v9  ;;  %v3415_v9 = vld [vmem:[#allocation32_spill] sm:$0xff] }
 0x202   : > { %v849_v54 = vsel %vm831_vm15, %v3407_v51, %v3405_v28  ;;  %v3408_v23 = vmov %v3405_v28  ;;  %v1256_v63 = vpack.c.bf16 %v1242_v2, %v1241_v0  ;;  %v1102_v16 = vmul.f32 %v2540_v31, %v3415_v9  ;;  %v3418_v28 = vld [vmem:[#allocation45_spill] sm:$0xff] }
 0x203   : > { %v887_v6 = vsel %vm831_vm15, %v3408_v23, 0.0  ;;  %v962_v1 = vmul.f32 %v2522_v20, %v849_v54  ;;  %v1188_v52 = vadd.f32 %v1172_v29, %v1152_v37  ;;  %v1189_v10 = vadd.f32 %v1173_v17, %v1153_v41 }
 0x204   : > { %v963_v47 = vmul.f32 %v2522_v20, %v887_v6  ;;  %v1068_v35 = vmul.f32 %v2530_v26, %v849_v54  ;;  %1744 = vmatmul.mubr.bf16.vlgmr.msra.gmra.mrb[0].mxu1 %v1256_v63  ;;  %v1046_v39 = vadd.f32 %v3413_v21, %v1010_v7  ;;  %v1047_v15 = vadd.f32 %v3414_v32, %v1011_v19 }
 0x205   : > { %v978_v44 = vadd.f32 %v962_v1, %v3411_v42  ;;  %v1069_v24 = vmul.f32 %v2530_v26, %v887_v6  ;;  %v1211_v8 = vadd.f32 %v2991_v48, %v1188_v52  ;;  %v1212_v38 = vadd.f32 %v2991_v48, %v1189_v10  ;;  %v3421_v1 = vld [vmem:[#allocation36_spill] sm:$0xff] }
 0x206   : > { %v979_v62 = vadd.f32 %v963_v47, %v3412_v49  ;;  %v1103_v46 = vmul.f32 %v2540_v31, %v3416_v13  ;;  %v1082_v57 = vadd.f32 %v1066_v25, %v1046_v39  ;;  %v1083_v18 = vadd.f32 %v1067_v59, %v1047_v15  ;;  %v3422_v47 = vld [vmem:[#allocation42_spill] sm:$0xff]  ;;  %v3423_v49 = vld [vmem:[#allocation33_spill] sm:$0xff] }
 0x207   : > { %v1138_v34 = vmul.f32 %v2548_v45, %v3406_v22  ;;  %v1139_v3 = vmul.f32 %v2548_v45, %v3404_v43  ;;  %v1227_v36 = vmax.f32 %v1211_v8, 0.0  ;;  %v1228_v14 = vmax.f32 %v1212_v38, 0.0 }
 0x208   : > { %v1174_v56 = vmul.f32 %v2553_v50, %v849_v54  ;;  %v1175_v29 = vmul.f32 %v2553_v50, %v887_v6  ;;  %v1118_v0 = vadd.f32 %v1102_v16, %v1082_v57  ;;  %v1119_v2 = vadd.f32 %v1103_v46, %v1083_v18  ;;  %v3426_v57 = vld [vmem:[#allocation54_spill] sm:$0xff] }
 0x209   : > { %v3417_v17 = vrot.slane %v2829_v12, 1  ;;  %v3419_v51 = vrot.slane %v3418_v28, 1  ;;  %v1243_v37 = vmin.f32 %v1227_v36, 6.0  ;;  %v1244_v43 = vmin.f32 %v1228_v14, 6.0  ;;  %v3427_v14 = vld [vmem:[#allocation60_spill] sm:$0xff] }
 0x20a   : > { %v1154_v23 = vadd.f32 %v1138_v34, %v1118_v0  ;;  %v1155_v6 = vadd.f32 %v1139_v3, %v1119_v2  ;;  %v1012_v63 = vadd.f32 %v3421_v1, %v3016_v27  ;;  %v1013_v5 = vadd.f32 %v3422_v47, %v3019_v55  ;;  %v3425_v27 = vld [vmem:[#allocation51_spill] sm:$0xff] }
 0x20b   : > { %v852_v25 = vsel %vm831_vm15, %v3419_v51, %v3417_v17  ;;  %v3420_v59 = vmov %v3417_v17  ;;  %v1257_v7 = vpack.c.bf16 %v1244_v43, %v1243_v37  ;;  %v1104_v15 = vmul.f32 %v2540_v31, %v3425_v27  ;;  %v3429_v2 = vld [vmem:[#allocation47_spill] sm:$0xff] }
 0x20c   : > { %v888_v22 = vsel %vm831_vm15, %v3420_v59, 0.0  ;;  %v964_v41 = vmul.f32 %v2522_v20, %v852_v25  ;;  %v1070_v52 = vmul.f32 %v2530_v26, %v852_v25  ;;  %v1190_v10 = vadd.f32 %v1174_v56, %v1154_v23  ;;  %v3431_v59 = vld [vmem:[#allocation59_spill] sm:$0xff] }
 0x20d   : > { %v965_v54 = vmul.f32 %v2522_v20, %v888_v22  ;;  %v1191_v42 = vadd.f32 %v1175_v29, %v1155_v6  ;;  %v1048_v21 = vadd.f32 %v3423_v49, %v1012_v63  ;;  %v3424_v20 = vld [vmem:[#allocation39_spill] sm:$0xff]  ;;  %1747 = vmatprep.mubr.bf16.mxu1 %v1257_v7  ;;  %v1071_v32 = vmul.f32 %v2530_v26, %v888_v22  ;;  %v3428_v29 = vld [vmem:[#allocation52_spill] sm:$0xff]  ;;  %v3435_v7 = vld [vmem:[#allocation57_spill] sm:$0xff] }
 0x20e   : > { %v980_v58 = vadd.f32 %v964_v41, %v2835_v11  ;;  %v1049_v39 = vadd.f32 %v3424_v20, %v1013_v5  ;;  %v1105_v55 = vmul.f32 %v2540_v31, %v2851_v61  ;;  %v1140_v11 = vmul.f32 %v2548_v45, %v3418_v28  ;;  %v3432_v37 = vld [vmem:[#allocation43_spill] sm:$0xff]  ;;  %v3433_v41 = vld [vmem:[#allocation46_spill] sm:$0xff] }
 0x20f   : > { %v981_v19 = vadd.f32 %v965_v54, %v2871_v53  ;;  %v1213_v53 = vadd.f32 %v2991_v48, %v1190_v10  ;;  %v1214_v8 = vadd.f32 %v2991_v48, %v1191_v42  ;;  %v1084_v38 = vadd.f32 %v1068_v35, %v1048_v21  ;;  %v3434_v1 = vld [vmem:[#allocation55_spill] sm:$0xff] }
 0x210   : > { %v1085_v9 = vadd.f32 %v1069_v24, %v1049_v39  ;;  %v1141_v16 = vmul.f32 %v2548_v45, %v2829_v12  ;;  %v1176_v13 = vmul.f32 %v2553_v50, %v852_v25  ;;  %v1177_v46 = vmul.f32 %v2553_v50, %v888_v22  ;;  %v3430_v24 = vld [vmem:[#allocation53_spill] sm:$0xff]  ;;  %v3438_v39 = vld [vmem:[#allocation50_spill] sm:$0xff] }
 0x211   : > { %v1014_v18 = vadd.f32 %v3426_v57, %v978_v44  ;;  %v1229_v34 = vmax.f32 %v1213_v53, 0.0  ;;  %v1230_v61 = vmax.f32 %v1214_v8, 0.0  ;;  %v1120_v3 = vadd.f32 %v1104_v15, %v1084_v38  ;;  %v3439_v15 = vld [vmem:[#allocation58_spill] sm:$0xff] }
 0x212   : > { %v1121_v36 = vadd.f32 %v1105_v55, %v1085_v9  ;;  %v1015_v56 = vadd.f32 %v3427_v14, %v979_v62  ;;  %v1106_v35 = vmul.f32 %v2540_v31, %v3429_v2  ;;  %v1107_v12 = vmul.f32 %v2540_v31, %v3430_v24  ;;  %v3440_v9 = vld [vmem:[#allocation48_spill] sm:$0xff] }
 0x213   : > { %v1050_v0 = vadd.f32 %v3428_v29, %v1014_v18  ;;  %v1245_v17 = vmin.f32 %v1229_v34, 6.0  ;;  %v1246_v28 = vmin.f32 %v1230_v61, 6.0  ;;  %v1156_v51 = vadd.f32 %v1140_v11, %v1120_v3 }
 0x214   : > { %v1157_v25 = vadd.f32 %v1141_v16, %v1121_v36  ;;  %v1051_v44 = vadd.f32 %v3431_v59, %v1015_v56  ;;  %v1142_v43 = vmul.f32 %v2548_v45, %v3432_v37  ;;  %v1143_v62 = vmul.f32 %v2548_v45, %v3433_v41  ;;  %v3447_v37 = vld [vmem:[#allocation69_spill] sm:$0xff] }
 0x215   : > { %v1086_v22 = vadd.f32 %v1070_v52, %v1050_v0  ;;  %v1258_v54 = vpack.c.bf16 %v1246_v28, %v1245_v17  ;;  %v1192_v23 = vadd.f32 %v1176_v13, %v1156_v51  ;;  %v1178_v63 = vmul.f32 %v2553_v50, %v3434_v1  ;;  %v3441_v13 = vld [vmem:[#allocation56_spill] sm:$0xff] }
 0x216   : > { %v1193_v6 = vadd.f32 %v1177_v46, %v1157_v25  ;;  %v1087_v47 = vadd.f32 %v1071_v32, %v1051_v44  ;;  %v1179_v10 = vmul.f32 %v2553_v50, %v3435_v7  ;;  %v3436_v42 = vrot.slane %v2874_v33, 1  ;;  %v3446_v44 = vld [vmem:[#allocation61_spill] sm:$0xff] }
 0x217   : > { %v1122_v5 = vadd.f32 %v1106_v35, %v1086_v22  ;;  %v3437_v52 = vrot.slane %v2848_v60, 1  ;;  %1748 = vmatmul.mubr.bf16.gmra.mrb[4].mxu1 %v1258_v54  ;;  %v1215_v21 = vadd.f32 %v2991_v48, %v1192_v23  ;;  %v1016_v27 = vadd.f32 %v3438_v39, %v980_v58  ;;  %v3442_v35 = vld [vmem:[#allocation64_spill] sm:$0xff] }
 0x218   : > { %v1216_v20 = vadd.f32 %v2991_v48, %v1193_v6  ;;  %v1017_v55 = vadd.f32 %v3439_v15, %v981_v19  ;;  %v1123_v32 = vadd.f32 %v1107_v12, %v1087_v47  ;;  %v1072_v53 = vmul.f32 %v2530_v26, %v3434_v1  ;;  %v3443_v12 = vld [vmem:[#allocation66_spill] sm:$0xff] }
 0x219   : > { %v858_v49 = vsel %vm831_vm15, %v3437_v52, %v3436_v42  ;;  %v1158_v11 = vadd.f32 %v1142_v43, %v1122_v5  ;;  %v1073_v8 = vmul.f32 %v2530_v26, %v3435_v7  ;;  %v1231_v60 = vmax.f32 %v1215_v21, 0.0  ;;  %v3449_v1 = vld [vmem:[#allocation62_spill] sm:$0xff] }
 0x21a   : > { %v1232_v38 = vmax.f32 %v1216_v20, 0.0  ;;  %v1052_v16 = vadd.f32 %v3440_v9, %v1016_v27  ;;  %v1053_v46 = vadd.f32 %v3441_v13, %v1017_v55  ;;  %v1159_v57 = vadd.f32 %v1143_v62, %v1123_v32  ;;  %v3448_v62 = vld [vmem:[#allocation67_spill] sm:$0xff] }
 0x21b   : > { %v1194_v18 = vadd.f32 %v1178_v63, %v1158_v11  ;;  %v1074_v58 = vmul.f32 %v2530_v26, %v858_v49  ;;  %v1109_v19 = vmul.f32 %v2540_v31, %v2903_v30  ;;  %v1247_v34 = vmin.f32 %v1231_v60, 6.0  ;;  %v3158_v9 = vld [vmem:[%s3278_s6] ss:$0 sm:$0xff] }
 0x21c   : > { %v1248_v61 = vmin.f32 %v1232_v38, 6.0  ;;  %v1088_v3 = vadd.f32 %v1072_v53, %v1052_v16  ;;  %v1089_v36 = vadd.f32 %v1073_v8, %v1053_v46  ;;  %v1111_v14 = vmul.f32 %v2540_v31, %v2897_v40  ;;  %v3444_v31 = vld [vmem:[#allocation63_spill] sm:$0xff] }
 0x21d   : > { %v1145_v56 = vmul.f32 %v2548_v45, %v2874_v33  ;;  %v1195_v29 = vadd.f32 %v1179_v10, %v1159_v57  ;;  %v1217_v0 = vadd.f32 %v2991_v48, %v1194_v18  ;;  %v1090_v17 = vadd.f32 %v1074_v58, %v3443_v12  ;;  %v3445_v33 = vld [vmem:[#allocation68_spill] sm:$0xff] }
 0x21e   : > { %v1259_v2 = vpack.c.bf16 %v1248_v61, %v1247_v34  ;;  %v1124_v24 = vadd.f32 %v3442_v35, %v1088_v3  ;;  %v1125_v26 = vadd.f32 %v1109_v19, %v1089_v36  ;;  %v1180_v51 = vmul.f32 %v2553_v50, %v858_v49  ;;  %v1889_v18 = vld [vmem:[%s2421_s11 + $0x20] sm:$0xff]  ;;  %v1890_v61 = vld [vmem:[%s2421_s11 + $0x10] sm:$0xff] }
 0x21f   : > { %v1218_v30 = vadd.f32 %v2991_v48, %v1195_v29  ;;  %v1233_v28 = vmax.f32 %v1217_v0, 0.0  ;;  %v1127_v25 = vadd.f32 %v1111_v14, %v2952_v4  ;;  %v1181_v59 = vmul.f32 %v2553_v50, %v3445_v33  ;;  %v3450_v4 = vld [vmem:[#allocation65_spill] sm:$0xff]  ;;  %v1892_v29 = vld [vmem:[%s2421_s11 + $0x18] sm:$0xff] }
 0x220   : > { %1751 = vmatprep.mubr.bf16.mxu1 %v1259_v2  ;;  %v1160_v40 = vadd.f32 %v3444_v31, %v1124_v24  ;;  %v1161_v45 = vadd.f32 %v1145_v56, %v1125_v26  ;;  %v1126_v22 = vadd.f32 %v3446_v44, %v1090_v17  ;;  %v1183_v43 = vmul.f32 %v2553_v50, %v3447_v37  ;;  %v1891_v14 = vld [vmem:[%s2421_s11 + $0x28] sm:$0xff]  ;;  %v1893_v17 = vld [vmem:[%s2421_s11 + $0x40] sm:$0xff] }
 0x221   : > { %v1234_v41 = vmax.f32 %v1218_v30, 0.0  ;;  %v1163_v54 = vadd.f32 %v3448_v62, %v1127_v25  ;;  %v1182_v47 = vmul.f32 %v2553_v50, %v3450_v4  ;;  %v1249_v5 = vmin.f32 %v1233_v28, 6.0  ;;  %v1894_v25 = vld [vmem:[%s2421_s11 + $0x30] sm:$0xff] }
 0x222   : > { %v1196_v23 = vadd.f32 %v1180_v51, %v1160_v40  ;;  %v1197_v6 = vadd.f32 %v1181_v59, %v1161_v45  ;;  %v1162_v63 = vadd.f32 %v3449_v1, %v1126_v22  ;;  %v1895_v45 = vld [vmem:[%s2421_s11 + $0x48] sm:$0xff]  ;;  %v1896_v59 = vld [vmem:[%s2421_s11 + $0x38] sm:$0xff] }
 0x223   : > { %v1250_v7 = vmin.f32 %v1234_v41, 6.0  ;;  %v1199_v10 = vadd.f32 %v1183_v43, %v1163_v54  ;;  %v1897_v54 = vld [vmem:[%s2421_s11 + $0x60] sm:$0xff] }
 0x224   : > { %v1219_v42 = vadd.f32 %v2991_v48, %v1196_v23  ;;  %v1220_v52 = vadd.f32 %v2991_v48, %v1197_v6  ;;  %v1198_v49 = vadd.f32 %v1182_v47, %v1162_v63  ;;  %v1898_v63 = vld [vmem:[%s2421_s11 + $0x50] sm:$0xff] }
 0x225   : > { %v1260_v21 = vpack.c.bf16 %v1250_v7, %v1249_v5  ;;  %v1222_v20 = vadd.f32 %v2991_v48, %v1199_v10  ;;  %v1899_v5 = vld [vmem:[%s2421_s11 + $0x68] sm:$0xff]  ;;  %v1900_v10 = vld [vmem:[%s2421_s11 + $0x58] sm:$0xff] }
 0x226   : > { %v1235_v39 = vmax.f32 %v1219_v42, 0.0  ;;  %v1236_v27 = vmax.f32 %v1220_v52, 0.0  ;;  %v1221_v15 = vadd.f32 %v2991_v48, %v1198_v49 }
 0x227   : > { %1752 = vmatmul.mubr.bf16.gmra.mrb[8].mxu1 %v1260_v21  ;;  %v1238_v55 = vmax.f32 %v1222_v20, 0.0 }
 0x228   : > { %v1251_v32 = vmin.f32 %v1235_v39, 6.0  ;;  %v1252_v50 = vmin.f32 %v1236_v27, 6.0  ;;  %v1237_v11 = vmax.f32 %v1221_v15, 0.0  ;;  %v1901_v27 = vld [vmem:[%s2421_s11 + $0x80] sm:$0xff] }
 0x229   : > { %v1254_v53 = vmin.f32 %v1238_v55, 6.0 }
 0x22a   : > { %v1261_v8 = vpack.c.bf16 %v1252_v50, %v1251_v32  ;;  %v1253_v60 = vmin.f32 %v1237_v11, 6.0  ;;  %v1902_v50 = vld [vmem:[%s2421_s11 + $0x70] sm:$0xff] }
 0x22c   : > { %1755 = vmatprep.mubr.bf16.mxu1 %v1261_v8  ;;  %v1262_v38 = vpack.c.bf16 %v1254_v53, %v1253_v60  ;;  %v1903_v8 = vld [vmem:[%s2421_s11 + $0x88] sm:$0xff] }
 0x22f   : > { %1756 = vmatmul.mubr.bf16.gmra.mrb[12].mxu1 %v1262_v38  ;;  %v1904_v38 = vld [vmem:[%s2421_s11 + $0x78] sm:$0xff]  ;;  %s2052_s11 = scalar_lea.vmem %s2051_s1, 4096 }
 0x230   : > { %p2054_p3 = scmp.lt.s32.totalorder %s2052_s11, %s2046_s12 }
 0x232   : > { %p2055_p2 = por %p2054_p3, %p2053_p13 }
 0x234   : > { %p2056_p0 = pnand %p2055_p2, %p2049_p11 }
 0x2d7   : > { %v1745_v48 = vpop.f32.mrb[0].mxu1 }
 0x2d8   : > { %v1377_v16 = vadd.f32 %v1745_v48, %v3158_v9  ;;  %v1368_v13 = vpop.f32.mrb[1].mxu1 }
 0x2d9   : > { %v1369_v46 = vadd.f32 %v3158_v9, %v1368_v13  ;;  %v1746_v57 = vpop.f32.mrb[2].mxu1 }
 0x2da   : > { %v1433_v58 = vadd.f32 %v1889_v18, %v1377_v16  ;;  %v1380_v19 = vadd.f32 %v1746_v57, %v3158_v9  ;;  %v1371_v34 = vpop.f32.mrb[3].mxu1 }
 0x2db   : > { %v1431_v3 = vadd.f32 %v1890_v61, %v1369_v46  ;;  %v1372_v36 = vadd.f32 %v3158_v9, %v1371_v34 }
 0x2dc   : > { %1449 = vst [vmem:[%s2419_s18 + $0x10] sm:$0xff] %v1433_v58  ;;  %v1434_v56 = vadd.f32 %v1891_v14, %v1380_v19 }
 0x2dd   : > { %1447 = vst [vmem:[%s2419_s18] sm:$0xff] %v1431_v3  ;;  %v1432_v0 = vadd.f32 %v1892_v29, %v1372_v36 }
 0x2de   : > { %1450 = vst [vmem:[%s2419_s18 + $0x18] sm:$0xff] %v1434_v56 }
 0x2df   : > { %1448 = vst [vmem:[%s2419_s18 + $0x8] sm:$0xff] %v1432_v0 }
 0x2ea   : > { %v1749_v2 = vpop.f32.mrb[4].mxu1 }
 0x2eb   : > { %v1393_v35 = vadd.f32 %v1749_v2, %v3158_v9  ;;  %v1384_v24 = vpop.f32.mrb[5].mxu1 }
 0x2ec   : > { %v1385_v26 = vadd.f32 %v3158_v9, %v1384_v24  ;;  %v1750_v12 = vpop.f32.mrb[6].mxu1 }
 0x2ed   : > { %v1437_v30 = vadd.f32 %v1893_v17, %v1393_v35  ;;  %v1396_v28 = vadd.f32 %v1750_v12, %v3158_v9  ;;  %v1387_v51 = vpop.f32.mrb[7].mxu1 }
 0x2ee   : > { %v1435_v31 = vadd.f32 %v1894_v25, %v1385_v26  ;;  %v1388_v40 = vadd.f32 %v3158_v9, %v1387_v51 }
 0x2ef   : > { %1453 = vst [vmem:[%s2419_s18 + $0x30] sm:$0xff] %v1437_v30  ;;  %v1438_v33 = vadd.f32 %v1895_v45, %v1396_v28 }
 0x2f0   : > { %1451 = vst [vmem:[%s2419_s18 + $0x20] sm:$0xff] %v1435_v31  ;;  %v1436_v44 = vadd.f32 %v1896_v59, %v1388_v40 }
 0x2f1   : > { %1454 = vst [vmem:[%s2419_s18 + $0x38] sm:$0xff] %v1438_v33 }
 0x2f2   : > { %1452 = vst [vmem:[%s2419_s18 + $0x28] sm:$0xff] %v1436_v44 }
 0x2fa   : > { %v1753_v22 = vpop.f32.mrb[8].mxu1 }
 0x2fb   : > { %v1409_v37 = vadd.f32 %v1753_v22, %v3158_v9  ;;  %v1400_v43 = vpop.f32.mrb[9].mxu1 }
 0x2fc   : > { %v1401_v41 = vadd.f32 %v3158_v9, %v1400_v43  ;;  %v1754_v62 = vpop.f32.mrb[10].mxu1 }
 0x2fd   : > { %v1441_v23 = vadd.f32 %v1897_v54, %v1409_v37  ;;  %v1412_v6 = vadd.f32 %v1754_v62, %v3158_v9  ;;  %v1403_v1 = vpop.f32.mrb[11].mxu1 }
 0x2fe   : > { %v1439_v4 = vadd.f32 %v1898_v63, %v1401_v41  ;;  %v1404_v47 = vadd.f32 %v3158_v9, %v1403_v1 }
 0x2ff   : > { %1457 = vst [vmem:[%s2419_s18 + $0x50] sm:$0xff] %v1441_v23  ;;  %v1442_v7 = vadd.f32 %v1899_v5, %v1412_v6 }
 0x300   : > { %1455 = vst [vmem:[%s2419_s18 + $0x40] sm:$0xff] %v1439_v4  ;;  %v1440_v42 = vadd.f32 %v1900_v10, %v1404_v47 }
 0x301   : > { %1458 = vst [vmem:[%s2419_s18 + $0x58] sm:$0xff] %v1442_v7 }
 0x302   : > { %1456 = vst [vmem:[%s2419_s18 + $0x48] sm:$0xff] %v1440_v42  ;;  %v1757_v52 = vpop.f32.mrb[12].mxu1 }
 0x303   : > { %v1425_v49 = vadd.f32 %v1757_v52, %v3158_v9  ;;  %v1416_v21 = vpop.f32.mrb[13].mxu1 }
 0x304   : > { %v1417_v20 = vadd.f32 %v3158_v9, %v1416_v21  ;;  %v1758_v39 = vpop.f32.mrb[14].mxu1 }
 0x305   : > { %v1445_v15 = vadd.f32 %v1901_v27, %v1425_v49  ;;  %v1428_v55 = vadd.f32 %v1758_v39, %v3158_v9  ;;  %v1419_v32 = vpop.f32.mrb[15].mxu1 }
 0x306   : > { %v1443_v11 = vadd.f32 %v1902_v50, %v1417_v20  ;;  %v1420_v53 = vadd.f32 %v3158_v9, %v1419_v32 }
 0x307   : > { %1461 = vst [vmem:[%s2419_s18 + $0x70] sm:$0xff] %v1445_v15  ;;  %v1446_v60 = vadd.f32 %v1903_v8, %v1428_v55 }
 0x308   : > { %1459 = vst [vmem:[%s2419_s18 + $0x60] sm:$0xff] %v1443_v11  ;;  %v1444_v48 = vadd.f32 %v1904_v38, %v1420_v53 }
 0x309   : > { %1462 = vst [vmem:[%s2419_s18 + $0x78] sm:$0xff] %v1446_v60 }
 0x30a   : > { %1460 = vst [vmem:[%s2419_s18 + $0x68] sm:$0xff] %v1444_v48 }
 0x30b   : > { %2059 = shalt.err (!%p2056_p0)
}
 0x30c   : > { %s2060_s18 = scalar_lea.hbm %s3214_s23, 2048  ;;  %s2064_s30 = scalar_lea.hbm %s3279_s7, 8192 }
 0x30d   : > { %p2061_p10 = scmp.ne.s32.totalorder %s3214_s23, %s2060_s18  ;;  %p2065_p8 = scmp.lt.u32.totalorder %s3214_s23, %s3279_s7 }
 0x30e   : > { %p2066_p5 = scmp.lt.u32.totalorder %s2064_s30, %s2060_s18  ;;  %p2068_p1 = scmp.lt.u32.totalorder %s2060_s18, %s3214_s23 }
 0x30f   : > { %p2062_p12 = pnand %p2061_p10, %p3452_p6 }
 0x310   : > { %p2067_p7 = por %p2066_p5, %p2065_p8 }
 0x311   : > { %p2063_p4 = pneg %p2062_p12 }
 0x312   : > { %p2069_p9 = por %p2068_p1, %p2067_p7 }
 0x314   : > { %p2070_p11 = pnand %p2069_p9, %p2063_p4 }
 0x316   : > { %2073 = shalt.err (!%p2070_p11)
}
 0x317   : > { %s2160_s24 = smov 128   ;;  %s2161_s13 = smov 8  }
 0x318   : > { %1775 = dma.vmem_to_hbm [thread:$0]  (%p3452_p6), %s3207_s27, 2048, %s3214_s23, %s3220_s19, %s2160_s24, %s2160_s24, %s2161_s13  }
 0x319 PF: > { %s3453_s14 = sld [smem:[#allocation21_spill]]  ;;  %s3454_s20 = sld [smem:[#allocation27_spill]] }
 0x31a   : > { %p1799_p13 = scmp.ge.s32.totalorder %s2150_s8, 2 }
 0x31f   : > { %s1494_s9 = sand.u32 1, %s3453_s14   ;;  %p3455_p3 = scmp.ne.s32.totalorder %s3454_s20, 0 }
 0x320   : > { %s1495_s28 = scalar_lea.sflag [#allocation6], %s1494_s9 }
 0x321   : > { %p1788_p2 = pnand %p1799_p13, %p3455_p3 }
 0x323   : > { %2117 = dma.done.wait (!%p1788_p2), %s1495_s28, 2048  }
 0x324   : > { %2119 = vsyncadd (!%p1788_p2), %s1495_s28, 4294965248  ;;  %s22_s8 = sadd.s32 1, %s2150_s8   ;;  %s3456_s10 = sld [smem:[#allocation22_spill]] }
 0x325   : > { %p19_p0 = scmp.ge.s32.totalorder %s22_s8, 6   ;;  %s3457_s26 = sld [smem:[#allocation28_spill]] }
 0x326   : > { %s3458_s27 = sld [smem:[#allocation23_spill]]  ;;  %s3459_s28 = sld [smem:[#allocation24_spill]] }
 0x327   : > { %s3460_s29 = sld [smem:[#allocation25_spill]]  ;;  %s3461_s30 = sld [smem:[#allocation26_spill]] }
 0x328   : > { %s3462_s24 = smov %s2126_s25  ;;  %21 = sbr.rel (!%p19_p0) target bundleno = 10 (0xa), region = 112 }
 0x32a   : > { %s3463_s25 = smov %s3456_s10 }
 0x32f   :  { %1500 = vsyncpa [#allocation5], 1 }
 0x330   :  { %1502 = vsyncpa [#allocation5 + $0x1], 1 }
 0x331   :  { %1503 = vsyncpa [#allocation8], 1 }
 0x332   :  { %1504 = vsyncpa [#allocation6], 1 }
 0x333   :  { %1506 = vsyncpa [#allocation6 + $0x1], 1 }
 0x334   :  { %1507 = vsyncmov [#allocation3] }
 0x337   :  { %s1508_s15 = vpop.sfrf %1507 }
 0x338   :  { %p1654_p6 = scmp.ne.s32.totalorder %s1508_s15, 0 }
 0x33a   :  { %1512 = shalt.err (%p1654_p6)  }
 0x33b   :  { %1514 = vsyncmov [#allocation3 + $0x1] }
 0x33e   :  { %s1515_s17 = vpop.sfrf %1514 }
 0x33f   :  { %p1655_p10 = scmp.ne.s32.totalorder %s1515_s17, 0 }
 0x341   :  { %1519 = shalt.err (%p1655_p10)  }

</bundles_post_ra>
